<compile_context>
chip_gen: v6e
topology: v6e:2x2x1
jax: 0.10.0
libtpu: 0.0.40
codegen_flags: <defaults>
</compile_context>

<pallas_src>
import jax
import jax.numpy as jnp
from jax.experimental import pallas as pl
from jax.experimental.pallas import tpu as pltpu

# ---------------- config (small, consistent with the module) ----------------
VOCAB = 64
D_MODEL = 32
CTX = 16          # context_window == sequence length used here
N_HEADS = 2
BATCH = 2
V_PAD = ((VOCAB + 127) // 128) * 128     # vocab padded to a full 128-lane vreg


# ----------------------------- fused Pallas kernel ---------------------------
def fused_forward_kernel(onehot_ref, emb_ref, scale_ref, wqkv_ref, cos_ref,
                         sin_ref, bones_ref, wo_ref, bo_ref, w1_ref, b1_ref,
                         wl_ref, bl_ref, o_ref):
    BS, D = scale_ref.shape            # B*S rows, d_model lanes
    HD = wo_ref.shape[0]               # H * D
    H = HD // D

    scale = scale_ref[...]             # (BS, D) f32 rms scale, tiled over batch
    cos = cos_ref[...]                 # (BS, D) f32
    sin = sin_ref[...]                 # (BS, D) f32 (sign-interleaved)
    bones = bones_ref[...]             # (BS, BS) f32: 1.0 same batch elem else 0.0

    # additive attention bias: 0 within a batch element, -1e30 across elements
    neg_bias = (bones - 1.0) * 1e30
    # per-row element count of its (S, D) normalization slab (= S*D)
    inv_n = 1.0 / (jnp.sum(bones, axis=-1, keepdims=True) * jnp.float32(D))

    def rmsnorm(y):
        # per-batch-element RMS over the whole (S, D) slab, batch-folded:
        # block-sum the squared rows with the 0/1 batch matrix (f32 MXU op).
        blocksum = jnp.dot(bones, y * y, preferred_element_type=jnp.float32)
        tot = jnp.sum(blocksum, axis=-1, keepdims=True)            # (BS, 1)
        return scale * y * jax.lax.rsqrt(tot * inv_n)

    # ---- embedding lookup: one-hot (built in wrapper) @ table (gather-free) ----
    x = jnp.dot(onehot_ref[...], emb_ref[...],
                preferred_element_type=jnp.float32)                 # (BS, D) f32
    x = rmsnorm(x)

    # ---- fused QKV (+ pre-folded pair-swapped Q/K for RoPE) projection ----
    # columns: [Wq_heads | Wk_heads | Wv_heads | (Wq@P)_heads | (Wk@P)_heads]
    qkv = jnp.dot(x.astype(jnp.bfloat16), wqkv_ref[...],
                  preferred_element_type=jnp.float32)               # (BS, 5*H*D)

    inv_sqrt_d = 1.0 / (float(D) ** 0.5)
    scores = []
    vals = []
    for h in range(H):
        q = qkv[:, h * D:(h + 1) * D]
        k = qkv[:, HD + h * D:HD + (h + 1) * D]
        v = qkv[:, 2 * HD + h * D:2 * HD + (h + 1) * D]
        qs = qkv[:, 3 * HD + h * D:3 * HD + (h + 1) * D]            # q @ P (folded)
        ks = qkv[:, 4 * HD + h * D:4 * HD + (h + 1) * D]            # k @ P (folded)
        q_rot = (q * cos + qs * sin).astype(jnp.bfloat16)
        k_rot = (k * cos + ks * sin).astype(jnp.bfloat16)
        s = jax.lax.dot_general(q_rot, k_rot, (((1,), (1,)), ((), ())),
                                preferred_element_type=jnp.float32)  # (BS, BS)
        scores.append(s * inv_sqrt_d + neg_bias)
        vals.append(v.astype(jnp.bfloat16))

    # ---- merged softmax: all heads stacked along sublanes -> one max/exp/sum ----
    s_all = jnp.concatenate(scores, axis=0)                          # (H*BS, BS)
    m = jnp.max(s_all, axis=-1, keepdims=True)
    p = jnp.exp(s_all - m)
    denom = jnp.sum(p, axis=-1, keepdims=True)
    attn = (p * pl.reciprocal(denom, approx=True)).astype(jnp.bfloat16)

    # ---- attn @ V and per-head Wo accumulation (no lane concat of heads) ----
    proj = jnp.zeros((BS, D), jnp.float32)
    for h in range(H):
        hout = jnp.dot(attn[h * BS:(h + 1) * BS, :], vals[h],
                       preferred_element_type=jnp.float32)           # (BS, D)
        proj = proj + jnp.dot(hout.astype(jnp.bfloat16),
                              wo_ref[h * D:(h + 1) * D, :],
                              preferred_element_type=jnp.float32)
    x = x + proj + bo_ref[...]

    # ---- second RMSNorm ----
    x = rmsnorm(x)

    # ---- FFN: x + ReLU(x @ W1 + b1) ----
    y = jnp.dot(x.astype(jnp.bfloat16), w1_ref[...],
                preferred_element_type=jnp.float32) + b1_ref[...]
    x = x + jnp.maximum(y, 0.0)

    # ---- final vocab projection (columns padded to 128 -> unmasked stores) ----
    logits = jnp.dot(x.astype(jnp.bfloat16), wl_ref[...],
                     preferred_element_type=jnp.float32) + bl_ref[...]
    o_ref[...] = logits.astype(o_ref.dtype)


# ----------------------------- pallas_call wrapper ----------------------------
def rope_model_forward_pallas(idx, packed):
    B, S = idx.shape
    BS = B * S
    V = VOCAB
    D = packed["emb"].shape[1]
    HD = packed["wo_2d"].shape[0]
    H = HD // D
    VP = packed["wl_pad"].shape[1]

    # one-hot token codes built in the wrapper (keeps index data out of a
    # degenerate (S,1)-lane VMEM block); bf16 feeds the MXU directly.
    onehot = jax.nn.one_hot(idx.reshape(BS), V, dtype=jnp.bfloat16)

    flops = 2 * BS * (V * D            # embedding one-hot matmul
                      + 2 * BS * D     # two RMS block-sum matmuls
                      + D * 5 * HD     # fused QKV projection
                      + 2 * H * BS * D # scores + attn @ V
                      + HD * D         # Wo
                      + D * D          # FFN
                      + D * VP)        # vocab projection
    bytes_accessed = int(sum(a.size * a.dtype.itemsize
                             for a in jax.tree_util.tree_leaves(packed))
                         + onehot.size * onehot.dtype.itemsize
                         + BS * VP * 4)

    vmem = lambda: pl.BlockSpec(memory_space=pltpu.MemorySpace.VMEM)

    out = pl.pallas_call(
        fused_forward_kernel,
        out_shape=jax.ShapeDtypeStruct((BS, VP), jnp.float32),
        in_specs=[vmem() for _ in range(13)],
        out_specs=vmem(),
        cost_estimate=pl.CostEstimate(flops=flops,
                                      transcendentals=H * BS * BS,
                                      bytes_accessed=bytes_accessed),
        # No grid / no dimension_semantics: whole batch in one step (single TC);
        # at B=2 the cross-TC split costs more in duplicated weight DMA + sync
        # than the sub-microsecond per-element compute it would parallelize.
    )(onehot, packed["emb"], packed["scale_t"], packed["w_qkv"],
      packed["cos_t"], packed["sin_t"], packed["batch_ones"],
      packed["wo_2d"], packed["bo"], packed["w1"], packed["b1"],
      packed["wl_pad"], packed["bl_pad"])

    return out[:, :V].reshape(B, S, V)


rope_model_forward = jax.jit(rope_model_forward_pallas)


# ----------------------------- model glue -------------------------------------
def build_rope_tables(S, D):
    # Standard RoPE; rotation q @ R[pos] expressed as elementwise cos/sin plus
    # an adjacent-pair swap (the swap is folded into the QKV weights).
    i = jnp.arange(D // 2, dtype=jnp.float32)
    theta = 10000.0 ** (-2.0 * i / D)                             # (D/2,)
    ang = jnp.arange(S, dtype=jnp.float32)[:, None] * theta[None, :]
    cos = jnp.repeat(jnp.cos(ang), 2, axis=1)                     # (S, D)
    s = jnp.sin(ang)
    sin = jnp.stack([s, -s], axis=-1).reshape(S, D)               # sign-interleaved
    perm = jnp.eye(D, dtype=jnp.float32)[jnp.arange(D) ^ 1]       # swap adjacent pairs
    return cos, sin, perm


def init_params(key):
    ks = jax.random.split(key, 10)
    sd = 0.05
    return {
        "emb": jax.random.normal(ks[0], (VOCAB, D_MODEL), jnp.float32) * sd,
        "rms_scale": jnp.ones((CTX, D_MODEL), jnp.float32),
        # per-head q/k/v weights, stored (H, in, out) == (H, D, D)
        "wq_t": jax.random.normal(ks[1], (N_HEADS, D_MODEL, D_MODEL), jnp.float32) * sd,
        "wk_t": jax.random.normal(ks[2], (N_HEADS, D_MODEL, D_MODEL), jnp.float32) * sd,
        "wv_t": jax.random.normal(ks[3], (N_HEADS, D_MODEL, D_MODEL), jnp.float32) * sd,
        # attention output projection (H*D -> D)
        "wo_t": jax.random.normal(ks[4], (N_HEADS * D_MODEL, D_MODEL), jnp.float32) * sd,
        "bo": jax.random.normal(ks[5], (1, D_MODEL), jnp.float32) * sd,
        # feed-forward (D -> D) + ReLU
        "w1_t": jax.random.normal(ks[6], (D_MODEL, D_MODEL), jnp.float32) * sd,
        "b1": jax.random.normal(ks[7], (1, D_MODEL), jnp.float32) * sd,
        # last linear (D -> vocab)
        "wl_t": jax.random.normal(ks[8], (D_MODEL, VOCAB), jnp.float32) * sd,
        "bl": jax.random.normal(ks[9], (1, VOCAB), jnp.float32) * sd,
    }


def pack_params(params, cos, sin, perm, batch):
    """Repack the module parameters for the fused, batch-folded, bf16 kernel."""
    H, D, _ = params["wq_t"].shape
    S = cos.shape[0]
    V = params["wl_t"].shape[1]

    def heads_to_cols(w):  # (H, D_in, D_out) -> (D_in, H*D_out)
        return jnp.transpose(w, (1, 0, 2)).reshape(D, H * D)

    wq_all = heads_to_cols(params["wq_t"])
    wk_all = heads_to_cols(params["wk_t"])
    wv_all = heads_to_cols(params["wv_t"])
    wq_sw = heads_to_cols(jnp.einsum("hij,jk->hik", params["wq_t"], perm))
    wk_sw = heads_to_cols(jnp.einsum("hij,jk->hik", params["wk_t"], perm))
    w_qkv = jnp.concatenate([wq_all, wk_all, wv_all, wq_sw, wk_sw],
                            axis=1).astype(jnp.bfloat16)

    # vocab projection padded to a full 128-lane width (zero columns)
    wl_pad = jnp.zeros((D, V_PAD), jnp.float32).at[:, :V].set(
        params["wl_t"]).astype(jnp.bfloat16)
    bl_pad = jnp.zeros((1, V_PAD), jnp.float32).at[:, :V].set(params["bl"])

    # (B*S, B*S) batch-block matrix: 1.0 for rows of the same batch element
    bvec = jnp.repeat(jnp.arange(batch), S)
    batch_ones = (bvec[:, None] == bvec[None, :]).astype(jnp.float32)

    return {
        "emb": params["emb"].astype(jnp.bfloat16),
        "scale_t": jnp.tile(params["rms_scale"], (batch, 1)),
        "w_qkv": w_qkv,
        "cos_t": jnp.tile(cos, (batch, 1)),
        "sin_t": jnp.tile(sin, (batch, 1)),
        "batch_ones": batch_ones,
        "wo_2d": params["wo_t"].astype(jnp.bfloat16),
        "bo": params["bo"],
        "w1": params["w1_t"].astype(jnp.bfloat16),
        "b1": params["b1"],
        "wl_pad": wl_pad,
        "bl_pad": bl_pad,
    }


def reference_forward(idx, params, cos, sin, perm, mxu_dtype=jnp.float32):
    """Pure-JAX reference. mxu_dtype=bfloat16 mirrors the kernel's MXU input
    casts (f32 accumulation), mxu_dtype=float32 is the module-faithful math."""
    def mm(a, b):
        return jnp.matmul(a.astype(mxu_dtype), b.astype(mxu_dtype),
                          preferred_element_type=jnp.float32)

    x = params["emb"].astype(mxu_dtype)[idx].astype(jnp.float32)   # (B, S, D)

    def rms(y):
        ms = jnp.mean(y * y, axis=(1, 2), keepdims=True)
        return params["rms_scale"][None] * y / jnp.sqrt(ms)

    x = rms(x)
    outs = []
    for h in range(N_HEADS):
        q = mm(x, params["wq_t"][h])
        k = mm(x, params["wk_t"][h])
        v = mm(x, params["wv_t"][h])
        qr = q * cos + jnp.matmul(q, perm) * sin      # exact column permutation
        kr = k * cos + jnp.matmul(k, perm) * sin
        s = jnp.einsum("bqd,bkd->bqk", qr.astype(mxu_dtype), kr.astype(mxu_dtype),
                       preferred_element_type=jnp.float32)
        s = s / jnp.sqrt(jnp.float32(D_MODEL))
        a = jax.nn.softmax(s, axis=-1)
        outs.append(jnp.einsum("bqk,bkd->bqd", a.astype(mxu_dtype),
                               v.astype(mxu_dtype),
                               preferred_element_type=jnp.float32))
    attn = mm(jnp.concatenate(outs, axis=-1), params["wo_t"]) + params["bo"][0]
    x = x + attn
    x = rms(x)
    x = x + jnp.maximum(mm(x, params["w1_t"]) + params["b1"][0], 0.0)
    return mm(x, params["wl_t"]) + params["bl"][0]


if __name__ == "__main__":
    key = jax.random.PRNGKey(0)
    pkey, ikey = jax.random.split(key)
    params = init_params(pkey)
    cos, sin, perm = build_rope_tables(CTX, D_MODEL)
    packed = pack_params(params, cos, sin, perm, BATCH)

    idx = jax.random.randint(ikey, (BATCH, CTX), 0, VOCAB, dtype=jnp.int32)

    logits = rope_model_forward(idx, packed)
    logits = jax.block_until_ready(logits)
    assert logits.shape == (BATCH, CTX, VOCAB), logits.shape

    # Tight check vs a reference that mirrors the kernel's bf16 MXU inputs,
    # plus a looser sanity check vs full-f32 module-faithful math.
    ref_bf16 = reference_forward(idx, params, cos, sin, perm, jnp.bfloat16)
    ref_f32 = reference_forward(idx, params, cos, sin, perm, jnp.float32)
    err_matched = float(jnp.max(jnp.abs(logits - ref_bf16)))
    err_f32 = float(jnp.max(jnp.abs(logits - ref_f32)))
    assert err_matched < 3e-3, f"mismatch vs bf16-matched reference: {err_matched}"
    assert err_f32 < 3e-2, f"mismatch vs f32 reference: {err_f32}"

    print("KERNEL_OK")
</pallas_src>

<mosaic_0001>
module attributes {stable_mosaic.version = 11 : i64} {
  func.func @fused_forward_kernel(%arg0: memref<32x64xbf16, #tpu.memory_space<vmem>>, %arg1: memref<64x32xbf16, #tpu.memory_space<vmem>>, %arg2: memref<32x32xf32, #tpu.memory_space<vmem>>, %arg3: memref<32x320xbf16, #tpu.memory_space<vmem>>, %arg4: memref<32x32xf32, #tpu.memory_space<vmem>>, %arg5: memref<32x32xf32, #tpu.memory_space<vmem>>, %arg6: memref<32x32xf32, #tpu.memory_space<vmem>>, %arg7: memref<64x32xbf16, #tpu.memory_space<vmem>>, %arg8: memref<1x32xf32, #tpu.memory_space<vmem>>, %arg9: memref<32x32xbf16, #tpu.memory_space<vmem>>, %arg10: memref<1x32xf32, #tpu.memory_space<vmem>>, %arg11: memref<32x128xbf16, #tpu.memory_space<vmem>>, %arg12: memref<1x128xf32, #tpu.memory_space<vmem>>, %arg13: memref<32x128xf32, #tpu.memory_space<vmem>>) attributes {dimension_semantics = [], scalar_prefetch = 0 : i64, scratch_operands = 0 : i64, tpu.core_type = #tpu.core_type<tc>} {
    %c0 = arith.constant 0 : index
    %c0_0 = arith.constant 0 : index
    %0 = vector.load %arg2[%c0, %c0_0] : memref<32x32xf32, #tpu.memory_space<vmem>>, vector<32x32xf32>
    %c0_1 = arith.constant 0 : index
    %c0_2 = arith.constant 0 : index
    %1 = vector.load %arg4[%c0_1, %c0_2] : memref<32x32xf32, #tpu.memory_space<vmem>>, vector<32x32xf32>
    %c0_3 = arith.constant 0 : index
    %c0_4 = arith.constant 0 : index
    %2 = vector.load %arg5[%c0_3, %c0_4] : memref<32x32xf32, #tpu.memory_space<vmem>>, vector<32x32xf32>
    %c0_5 = arith.constant 0 : index
    %c0_6 = arith.constant 0 : index
    %3 = vector.load %arg6[%c0_5, %c0_6] : memref<32x32xf32, #tpu.memory_space<vmem>>, vector<32x32xf32>
    %cst = arith.constant 1.000000e+00 : f32
    %4 = vector.broadcast %cst : f32 to vector<32x32xf32>
    %5 = arith.subf %3, %4 : vector<32x32xf32>
    %cst_7 = arith.constant 1.000000e+30 : f32
    %6 = vector.broadcast %cst_7 : f32 to vector<32x32xf32>
    %7 = arith.mulf %5, %6 : vector<32x32xf32>
    %cst_8 = arith.constant dense<0.000000e+00> : vector<32xf32>
    %8 = vector.multi_reduction <add>, %3, %cst_8 [1] : vector<32x32xf32> to vector<32xf32>
    %9 = vector.shape_cast %8 : vector<32xf32> to vector<32x1xf32>
    %cst_9 = arith.constant 3.200000e+01 : f32
    %10 = vector.broadcast %cst_9 : f32 to vector<32x1xf32>
    %11 = arith.mulf %9, %10 : vector<32x1xf32>
    %cst_10 = arith.constant 1.000000e+00 : f32
    %12 = vector.broadcast %cst_10 : f32 to vector<32x1xf32>
    %13 = arith.divf %12, %11 : vector<32x1xf32>
    %c0_11 = arith.constant 0 : index
    %c0_12 = arith.constant 0 : index
    %14 = vector.load %arg0[%c0_11, %c0_12] : memref<32x64xbf16, #tpu.memory_space<vmem>>, vector<32x64xbf16>
    %c0_13 = arith.constant 0 : index
    %c0_14 = arith.constant 0 : index
    %15 = vector.load %arg1[%c0_13, %c0_14] : memref<64x32xbf16, #tpu.memory_space<vmem>>, vector<64x32xbf16>
    %cst_15 = arith.constant dense<0.000000e+00> : vector<32x32xf32>
    %16 = tpu.matmul %14, %15, %cst_15 {dimension_numbers = #tpu.dot_dimension_numbers<[1], [0], [0], [1], [0, 0, 1, 1], [], []>} : vector<32x64xbf16>, vector<64x32xbf16>, vector<32x32xf32> -> vector<32x32xf32>
    %17 = arith.mulf %16, %16 : vector<32x32xf32>
    %cst_16 = arith.constant dense<0.000000e+00> : vector<32x32xf32>
    %18 = tpu.matmul %3, %17, %cst_16 {dimension_numbers = #tpu.dot_dimension_numbers<[1], [0], [0], [1], [0, 0, 1, 1], [], []>} : vector<32x32xf32>, vector<32x32xf32>, vector<32x32xf32> -> vector<32x32xf32>
    %cst_17 = arith.constant dense<0.000000e+00> : vector<32xf32>
    %19 = vector.multi_reduction <add>, %18, %cst_17 [1] : vector<32x32xf32> to vector<32xf32>
    %20 = vector.shape_cast %19 : vector<32xf32> to vector<32x1xf32>
    %21 = arith.mulf %0, %16 : vector<32x32xf32>
    %22 = arith.mulf %20, %13 : vector<32x1xf32>
    %23 = math.rsqrt %22 : vector<32x1xf32>
    %24 = vector.broadcast %23 : vector<32x1xf32> to vector<32x32xf32>
    %25 = arith.mulf %21, %24 : vector<32x32xf32>
    %26 = arith.truncf %25 : vector<32x32xf32> to vector<32x32xbf16>
    %c0_18 = arith.constant 0 : index
    %c0_19 = arith.constant 0 : index
    %27 = vector.load %arg3[%c0_18, %c0_19] : memref<32x320xbf16, #tpu.memory_space<vmem>>, vector<32x320xbf16>
    %cst_20 = arith.constant dense<0.000000e+00> : vector<32x320xf32>
    %28 = tpu.matmul %26, %27, %cst_20 {dimension_numbers = #tpu.dot_dimension_numbers<[1], [0], [0], [1], [0, 0, 1, 1], [], []>} : vector<32x32xbf16>, vector<32x320xbf16>, vector<32x320xf32> -> vector<32x320xf32>
    %29 = vector.extract_strided_slice %28 {offsets = [0, 0], sizes = [32, 32], strides = [1, 1]} : vector<32x320xf32> to vector<32x32xf32>
    %30 = vector.extract_strided_slice %28 {offsets = [0, 64], sizes = [32, 32], strides = [1, 1]} : vector<32x320xf32> to vector<32x32xf32>
    %31 = vector.extract_strided_slice %28 {offsets = [0, 128], sizes = [32, 32], strides = [1, 1]} : vector<32x320xf32> to vector<32x32xf32>
    %32 = vector.extract_strided_slice %28 {offsets = [0, 192], sizes = [32, 32], strides = [1, 1]} : vector<32x320xf32> to vector<32x32xf32>
    %33 = vector.extract_strided_slice %28 {offsets = [0, 256], sizes = [32, 32], strides = [1, 1]} : vector<32x320xf32> to vector<32x32xf32>
    %34 = arith.mulf %29, %1 : vector<32x32xf32>
    %35 = arith.mulf %32, %2 : vector<32x32xf32>
    %36 = arith.addf %34, %35 : vector<32x32xf32>
    %37 = arith.truncf %36 : vector<32x32xf32> to vector<32x32xbf16>
    %38 = arith.mulf %30, %1 : vector<32x32xf32>
    %39 = arith.mulf %33, %2 : vector<32x32xf32>
    %40 = arith.addf %38, %39 : vector<32x32xf32>
    %41 = arith.truncf %40 : vector<32x32xf32> to vector<32x32xbf16>
    %cst_21 = arith.constant dense<0.000000e+00> : vector<32x32xf32>
    %42 = tpu.matmul %37, %41, %cst_21 {dimension_numbers = #tpu.dot_dimension_numbers<[1], [1], [0], [0], [0, 0, 1, 0], [], []>} : vector<32x32xbf16>, vector<32x32xbf16>, vector<32x32xf32> -> vector<32x32xf32>
    %cst_22 = arith.constant 0.176776692 : f32
    %43 = vector.broadcast %cst_22 : f32 to vector<32x32xf32>
    %44 = arith.mulf %42, %43 : vector<32x32xf32>
    %45 = arith.addf %44, %7 : vector<32x32xf32>
    %46 = arith.truncf %31 : vector<32x32xf32> to vector<32x32xbf16>
    %47 = vector.extract_strided_slice %28 {offsets = [0, 32], sizes = [32, 32], strides = [1, 1]} : vector<32x320xf32> to vector<32x32xf32>
    %48 = vector.extract_strided_slice %28 {offsets = [0, 96], sizes = [32, 32], strides = [1, 1]} : vector<32x320xf32> to vector<32x32xf32>
    %49 = vector.extract_strided_slice %28 {offsets = [0, 160], sizes = [32, 32], strides = [1, 1]} : vector<32x320xf32> to vector<32x32xf32>
    %50 = vector.extract_strided_slice %28 {offsets = [0, 224], sizes = [32, 32], strides = [1, 1]} : vector<32x320xf32> to vector<32x32xf32>
    %51 = vector.extract_strided_slice %28 {offsets = [0, 288], sizes = [32, 32], strides = [1, 1]} : vector<32x320xf32> to vector<32x32xf32>
    %52 = arith.mulf %47, %1 : vector<32x32xf32>
    %53 = arith.mulf %50, %2 : vector<32x32xf32>
    %54 = arith.addf %52, %53 : vector<32x32xf32>
    %55 = arith.truncf %54 : vector<32x32xf32> to vector<32x32xbf16>
    %56 = arith.mulf %48, %1 : vector<32x32xf32>
    %57 = arith.mulf %51, %2 : vector<32x32xf32>
    %58 = arith.addf %56, %57 : vector<32x32xf32>
    %59 = arith.truncf %58 : vector<32x32xf32> to vector<32x32xbf16>
    %cst_23 = arith.constant dense<0.000000e+00> : vector<32x32xf32>
    %60 = tpu.matmul %55, %59, %cst_23 {dimension_numbers = #tpu.dot_dimension_numbers<[1], [1], [0], [0], [0, 0, 1, 0], [], []>} : vector<32x32xbf16>, vector<32x32xbf16>, vector<32x32xf32> -> vector<32x32xf32>
    %cst_24 = arith.constant 0.176776692 : f32
    %61 = vector.broadcast %cst_24 : f32 to vector<32x32xf32>
    %62 = arith.mulf %60, %61 : vector<32x32xf32>
    %63 = arith.addf %62, %7 : vector<32x32xf32>
    %64 = arith.truncf %49 : vector<32x32xf32> to vector<32x32xbf16>
    %65 = tpu.concatenate %45, %63 in 0 : vector<32x32xf32>, vector<32x32xf32> -> vector<64x32xf32>
    %cst_25 = arith.constant dense<0xFF800000> : vector<64xf32>
    %66 = vector.multi_reduction <maximumf>, %65, %cst_25 [1] : vector<64x32xf32> to vector<64xf32>
    %67 = vector.shape_cast %66 : vector<64xf32> to vector<64x1xf32>
    %68 = vector.broadcast %67 : vector<64x1xf32> to vector<64x32xf32>
    %69 = arith.subf %65, %68 : vector<64x32xf32>
    %70 = math.exp %69 : vector<64x32xf32>
    %cst_26 = arith.constant dense<0.000000e+00> : vector<64xf32>
    %71 = vector.multi_reduction <add>, %70, %cst_26 [1] : vector<64x32xf32> to vector<64xf32>
    %72 = vector.shape_cast %71 : vector<64xf32> to vector<64x1xf32>
    %73 = tpu.reciprocal %72 {approx = true} : vector<64x1xf32> -> vector<64x1xf32>
    %74 = vector.broadcast %73 : vector<64x1xf32> to vector<64x32xf32>
    %75 = arith.mulf %70, %74 : vector<64x32xf32>
    %76 = arith.truncf %75 : vector<64x32xf32> to vector<64x32xbf16>
    %cst_27 = arith.constant 0.000000e+00 : f32
    %77 = vector.broadcast %cst_27 : f32 to vector<32x32xf32>
    %78 = vector.extract_strided_slice %76 {offsets = [0, 0], sizes = [32, 32], strides = [1, 1]} : vector<64x32xbf16> to vector<32x32xbf16>
    %cst_28 = arith.constant dense<0.000000e+00> : vector<32x32xf32>
    %79 = tpu.matmul %78, %46, %cst_28 {dimension_numbers = #tpu.dot_dimension_numbers<[1], [0], [0], [1], [0, 0, 1, 1], [], []>} : vector<32x32xbf16>, vector<32x32xbf16>, vector<32x32xf32> -> vector<32x32xf32>
    %80 = arith.truncf %79 : vector<32x32xf32> to vector<32x32xbf16>
    %c0_29 = arith.constant 0 : index
    %c0_30 = arith.constant 0 : index
    %81 = vector.load %arg7[%c0_29, %c0_30] : memref<64x32xbf16, #tpu.memory_space<vmem>>, vector<32x32xbf16>
    %cst_31 = arith.constant dense<0.000000e+00> : vector<32x32xf32>
    %82 = tpu.matmul %80, %81, %cst_31 {dimension_numbers = #tpu.dot_dimension_numbers<[1], [0], [0], [1], [0, 0, 1, 1], [], []>} : vector<32x32xbf16>, vector<32x32xbf16>, vector<32x32xf32> -> vector<32x32xf32>
    %83 = arith.addf %77, %82 : vector<32x32xf32>
    %84 = vector.extract_strided_slice %76 {offsets = [32, 0], sizes = [32, 32], strides = [1, 1]} : vector<64x32xbf16> to vector<32x32xbf16>
    %cst_32 = arith.constant dense<0.000000e+00> : vector<32x32xf32>
    %85 = tpu.matmul %84, %64, %cst_32 {dimension_numbers = #tpu.dot_dimension_numbers<[1], [0], [0], [1], [0, 0, 1, 1], [], []>} : vector<32x32xbf16>, vector<32x32xbf16>, vector<32x32xf32> -> vector<32x32xf32>
    %86 = arith.truncf %85 : vector<32x32xf32> to vector<32x32xbf16>
    %c32 = arith.constant 32 : index
    %c0_33 = arith.constant 0 : index
    %87 = vector.load %arg7[%c32, %c0_33] : memref<64x32xbf16, #tpu.memory_space<vmem>>, vector<32x32xbf16>
    %cst_34 = arith.constant dense<0.000000e+00> : vector<32x32xf32>
    %88 = tpu.matmul %86, %87, %cst_34 {dimension_numbers = #tpu.dot_dimension_numbers<[1], [0], [0], [1], [0, 0, 1, 1], [], []>} : vector<32x32xbf16>, vector<32x32xbf16>, vector<32x32xf32> -> vector<32x32xf32>
    %89 = arith.addf %83, %88 : vector<32x32xf32>
    %90 = arith.addf %25, %89 : vector<32x32xf32>
    %c0_35 = arith.constant 0 : index
    %c0_36 = arith.constant 0 : index
    %91 = vector.load %arg8[%c0_35, %c0_36] : memref<1x32xf32, #tpu.memory_space<vmem>>, vector<1x32xf32>
    %92 = vector.broadcast %91 : vector<1x32xf32> to vector<32x32xf32>
    %93 = arith.addf %90, %92 : vector<32x32xf32>
    %94 = arith.mulf %93, %93 : vector<32x32xf32>
    %cst_37 = arith.constant dense<0.000000e+00> : vector<32x32xf32>
    %95 = tpu.matmul %3, %94, %cst_37 {dimension_numbers = #tpu.dot_dimension_numbers<[1], [0], [0], [1], [0, 0, 1, 1], [], []>} : vector<32x32xf32>, vector<32x32xf32>, vector<32x32xf32> -> vector<32x32xf32>
    %cst_38 = arith.constant dense<0.000000e+00> : vector<32xf32>
    %96 = vector.multi_reduction <add>, %95, %cst_38 [1] : vector<32x32xf32> to vector<32xf32>
    %97 = vector.shape_cast %96 : vector<32xf32> to vector<32x1xf32>
    %98 = arith.mulf %0, %93 : vector<32x32xf32>
    %99 = arith.mulf %97, %13 : vector<32x1xf32>
    %100 = math.rsqrt %99 : vector<32x1xf32>
    %101 = vector.broadcast %100 : vector<32x1xf32> to vector<32x32xf32>
    %102 = arith.mulf %98, %101 : vector<32x32xf32>
    %103 = arith.truncf %102 : vector<32x32xf32> to vector<32x32xbf16>
    %c0_39 = arith.constant 0 : index
    %c0_40 = arith.constant 0 : index
    %104 = vector.load %arg9[%c0_39, %c0_40] : memref<32x32xbf16, #tpu.memory_space<vmem>>, vector<32x32xbf16>
    %cst_41 = arith.constant dense<0.000000e+00> : vector<32x32xf32>
    %105 = tpu.matmul %103, %104, %cst_41 {dimension_numbers = #tpu.dot_dimension_numbers<[1], [0], [0], [1], [0, 0, 1, 1], [], []>} : vector<32x32xbf16>, vector<32x32xbf16>, vector<32x32xf32> -> vector<32x32xf32>
    %c0_42 = arith.constant 0 : index
    %c0_43 = arith.constant 0 : index
    %106 = vector.load %arg10[%c0_42, %c0_43] : memref<1x32xf32, #tpu.memory_space<vmem>>, vector<1x32xf32>
    %107 = vector.broadcast %106 : vector<1x32xf32> to vector<32x32xf32>
    %108 = arith.addf %105, %107 : vector<32x32xf32>
    %cst_44 = arith.constant 0.000000e+00 : f32
    %109 = vector.broadcast %cst_44 : f32 to vector<32x32xf32>
    %110 = arith.maximumf %108, %109 : vector<32x32xf32>
    %111 = arith.addf %102, %110 : vector<32x32xf32>
    %112 = arith.truncf %111 : vector<32x32xf32> to vector<32x32xbf16>
    %c0_45 = arith.constant 0 : index
    %c0_46 = arith.constant 0 : index
    %113 = vector.load %arg11[%c0_45, %c0_46] : memref<32x128xbf16, #tpu.memory_space<vmem>>, vector<32x128xbf16>
    %cst_47 = arith.constant dense<0.000000e+00> : vector<32x128xf32>
    %114 = tpu.matmul %112, %113, %cst_47 {dimension_numbers = #tpu.dot_dimension_numbers<[1], [0], [0], [1], [0, 0, 1, 1], [], []>} : vector<32x32xbf16>, vector<32x128xbf16>, vector<32x128xf32> -> vector<32x128xf32>
    %c0_48 = arith.constant 0 : index
    %c0_49 = arith.constant 0 : index
    %115 = vector.load %arg12[%c0_48, %c0_49] : memref<1x128xf32, #tpu.memory_space<vmem>>, vector<1x128xf32>
    %116 = vector.broadcast %115 : vector<1x128xf32> to vector<32x128xf32>
    %117 = arith.addf %114, %116 : vector<32x128xf32>
    %c0_50 = arith.constant 0 : index
    %c0_51 = arith.constant 0 : index
    %118 = vector.load %arg13[%c0_50, %c0_51] : memref<32x128xf32, #tpu.memory_space<vmem>>, vector<32x128xf32>
    tpu.vector_store %arg13[%c0_50, %c0_51], %117 {strides = array<i32>} : memref<32x128xf32, #tpu.memory_space<vmem>>, vector<32x128xf32>,
    return
  }
}

</mosaic_0001>

<bundles_post_ra>
// kernel: eq.1
= control target key start
LH: loop header
LB: loop body
LE: loop exit
PB: predicated region body
PF: predicated region fallthrough
CT: control target
= control target key end

     0   :  { %2 = vsyncpa [#allocation1], 0  ;;  %s59_s6 = smov [#allocation0]   ;;  %s77_s0 = inlined_call_operand.hbm [shape: s32[2,16], index: 0, kind: input, shape index: {}]   ;;  %s78_s1 = inlined_call_operand.vmem [shape: s32[32], index: 1, kind: output, shape index: {}]  }
   0x1   :  { %s7_s7 = sshll.u32 %s59_s6, 4  ;;  %s8_s7 = int_to_ptr.vmem [resolvable:$true] %s7_s7 }
   0x2   :  { %s45_s8 = scalar_lea.vmem %s8_s7, 32  ;;  %p50_p1 = scmp.lt.s32.totalorder %s8_s7, %s8_s7 }
   0x3   :  { %p46_p0 = scmp.ne.s32.totalorder %s8_s7, %s45_s8  ;;  %p51_p2 = scmp.lt.s32.totalorder %s45_s8, %s45_s8 }
   0x5   :  { %p52_p3 = por %p51_p2, %p50_p1 }
   0x7   :  { %p53_p4 = pnand %p52_p3, %p46_p0 }
   0x9   :  { %56 = shalt.err (!%p53_p4)
}
   0xa   :  { %10 = dma.hbm_to_vmem [thread:$0]  %s77_s0, 32, %s8_s7, [#allocation1]  }
   0xb   :  { %57 = dma.done.wait [#allocation1], 32  }
   0xc   :  { %58 = vsyncadd [#allocation1], 4294967264  ;;  %v15_v0 = vld [vmem:[#allocation0] sm:$0x3]  ;;  %vm18_vm0 = vcmask 130048   ;;  %s60_s0 = smov 16  }
   0xd   :  { %16 = vst [vmem:[#allocation3] sm:$0x3] %v15_v0  ;;  %vm24_vm1 = vcmask 261248  }
  0x14   :  { %v17_v1 = vld [vmem:[#allocation3] sm:$0x1]   ;;  %v21_v2 = vld [vmem:[#allocation3 + $0x1] sm:$0x1]  }
  0x15   :  { %22 = vrot.lane.b32.xlu0 %v21_v2, %s60_s0  ;;  %19 = vst.msk [vmem:[#allocation2] sm:$0x1] %vm18_vm0, %v17_v1  }
  0x87   :  { %v23_v3 = vpop.permute.xlu0 %22  }
  0x88   :  { %25 = vst.msk [vmem:[#allocation2] sm:$0x1] %vm24_vm1, %v23_v3  }
  0x8f   :  { %v30_v4 = vld [vmem:[#allocation2] sm:$0x1] }
  0x90   :  { %33 = vst [vmem:[%s78_s1] sm:$0x1] %v30_v4 }
  0x91   :  { %34 = vsyncpa [#allocation1], 1 }

// kernel: rope_model_forward_pallas.1
= control target key start
LH: loop header
LB: loop body
LE: loop exit
PB: predicated region body
PF: predicated region fallthrough
CT: control target
= control target key end

     0   :  { %18 = vsyncpa [#allocation3], 0  ;;  %s2608_s0 = inlined_call_operand.vmem [shape: bf16[32,64], index: 0, kind: input, shape index: {}]   ;;  %s2609_s1 = inlined_call_operand.vmem [shape: bf16[64,32], index: 1, kind: input, shape index: {}]   ;;  %s2610_s2 = inlined_call_operand.vmem [shape: f32[32,32], index: 2, kind: input, shape index: {}]   ;;  %s2611_s3 = inlined_call_operand.vmem [shape: bf16[32,320], index: 3, kind: input, shape index: {}]   ;;  %s2612_s4 = inlined_call_operand.vmem [shape: f32[32,32], index: 4, kind: input, shape index: {}]   ;;  %s2613_s5 = inlined_call_operand.hbm [shape: f32[32,32], index: 5, kind: input, shape index: {}]   ;;  %s2614_s6 = inlined_call_operand.hbm [shape: f32[32,32], index: 6, kind: input, shape index: {}]   ;;  %s2615_s7 = inlined_call_operand.vmem [shape: bf16[64,32], index: 7, kind: input, shape index: {}]   ;;  %s2616_s8 = inlined_call_operand.hbm [shape: f32[1,32], index: 8, kind: input, shape index: {}]   ;;  %s2617_s9 = inlined_call_operand.hbm [shape: bf16[32,32], index: 9, kind: input, shape index: {}]   ;;  %s2618_s10 = inlined_call_operand.hbm [shape: f32[1,32], index: 10, kind: input, shape index: {}]   ;;  %s2619_s11 = inlined_call_operand.hbm [shape: bf16[32,128], index: 11, kind: input, shape index: {}]   ;;  %s2620_s12 = inlined_call_operand.hbm [shape: f32[1,128], index: 12, kind: input, shape index: {}]   ;;  %s2621_s13 = inlined_call_operand.hbm [shape: f32[32,128], index: 13, kind: output, shape index: {}]  }
   0x1   :  { %19 = vsyncpa [#allocation6], 0 }
   0x2   :  { %20 = vsyncpa [#allocation9], 0 }
   0x3   :  { %21 = vsyncpa [#allocation12], 0 }
   0x4   :  { %22 = vsyncpa [#allocation4], 0  ;;  %s2100_s25 = smov [#allocation5]   ;;  %s2101_s27 = smov [#allocation8]  }
   0x5   :  { %s50_s26 = sshll.u32 %s2100_s25, 4  ;;  %s74_s28 = sshll.u32 %s2101_s27, 4  ;;  %s51_s26 = int_to_ptr.vmem [resolvable:$true] %s50_s26  ;;  %s75_s28 = int_to_ptr.vmem [resolvable:$true] %s74_s28 }
   0x6   :  { %s1938_s29 = scalar_lea.vmem %s51_s26, 512  ;;  %p1943_p1 = scmp.lt.s32.totalorder %s51_s26, %s51_s26 }
   0x7   :  { %p1939_p0 = scmp.ne.s32.totalorder %s51_s26, %s1938_s29  ;;  %p1944_p2 = scmp.lt.s32.totalorder %s1938_s29, %s1938_s29 }
   0x9   :  { %p1945_p3 = por %p1944_p2, %p1943_p1 }
   0xb   :  { %p1946_p4 = pnand %p1945_p3, %p1939_p0 }
   0xd   :  { %1949 = shalt.err (!%p1946_p4)
}
   0xe   :  { %s2102_s30 = smov 128   ;;  %s2103_s14 = smov 8  }
   0xf   :  { %56 = dma.hbm_to_vmem [thread:$0]  %s2614_s6, 512, %s51_s26, [#allocation6], %s2102_s30, %s2102_s30, %s2103_s14  }
  0x10   :  { %s1958_s17 = scalar_lea.vmem %s75_s28, 256  ;;  %p1963_p6 = scmp.lt.s32.totalorder %s75_s28, %s75_s28 }
  0x11   :  { %p1959_p5 = scmp.ne.s32.totalorder %s75_s28, %s1958_s17  ;;  %p1964_p7 = scmp.lt.s32.totalorder %s1958_s17, %s1958_s17 }
  0x13   :  { %p1965_p8 = por %p1964_p7, %p1963_p6 }
  0x15   :  { %p1966_p9 = pnand %p1965_p8, %p1959_p5 }
  0x17   :  { %1969 = shalt.err (!%p1966_p9)
}
  0x18   :  { %s2104_s18 = smov 64   ;;  %s2105_s19 = smov 4  }
  0x19   :  { %80 = dma.hbm_to_vmem [thread:$0]  %s2617_s9, 256, %s75_s28, [#allocation9], %s2104_s18, %s2104_s18, %s2105_s19  }
  0x1a   :  { %s2106_s22 = smov [#allocation11]   ;;  %s2107_s24 = smov [#allocation2]  }
  0x1b   :  { %s96_s23 = sshll.u32 %s2106_s22, 4  ;;  %s38_s25 = sshll.u32 %s2107_s24, 4  ;;  %s97_s23 = int_to_ptr.vmem [resolvable:$true] %s96_s23  ;;  %s39_s25 = int_to_ptr.vmem [resolvable:$true] %s38_s25 }
  0x1c   :  { %s1978_s6 = scalar_lea.vmem %s97_s23, 256  ;;  %p1983_p11 = scmp.lt.s32.totalorder %s97_s23, %s97_s23 }
  0x1d   :  { %p1979_p10 = scmp.ne.s32.totalorder %s97_s23, %s1978_s6  ;;  %p1984_p12 = scmp.lt.s32.totalorder %s1978_s6, %s1978_s6 }
  0x1f   :  { %p1985_p13 = por %p1984_p12, %p1983_p11 }
  0x21   :  { %p1986_p0 = pnand %p1985_p13, %p1979_p10 }
  0x23   :  { %1989 = shalt.err (!%p1986_p0)
}
  0x24   :  { %102 = dma.hbm_to_vmem [thread:$0]  %s2619_s11, 256, %s97_s23, [#allocation12], %s2104_s18, %s2104_s18, %s2105_s19  }
  0x25   :  { %s1998_s9 = scalar_lea.vmem %s39_s25, 512  ;;  %p2003_p2 = scmp.lt.s32.totalorder %s39_s25, %s39_s25 }
  0x26   :  { %p1999_p1 = scmp.ne.s32.totalorder %s39_s25, %s1998_s9  ;;  %p2004_p3 = scmp.lt.s32.totalorder %s1998_s9, %s1998_s9 }
  0x28   :  { %p2005_p4 = por %p2004_p3, %p2003_p2 }
  0x2a   :  { %p2006_p5 = pnand %p2005_p4, %p1999_p1 }
  0x2c   :  { %2009 = shalt.err (!%p2006_p5)
}
  0x2d   :  { %44 = dma.hbm_to_vmem [thread:$0]  %s2613_s5, 512, %s39_s25, [#allocation3], %s2102_s30, %s2102_s30, %s2103_s14  }
  0x2e   :  { %s2108_s15 = smov [#allocation7]   ;;  %s2109_s17 = smov [#allocation10]  }
  0x2f   :  { %s65_s16 = sshll.u32 %s2108_s15, 4  ;;  %s87_s20 = sshll.u32 %s2109_s17, 4  ;;  %s66_s16 = int_to_ptr.vmem [resolvable:$true] %s65_s16  ;;  %s88_s20 = int_to_ptr.vmem [resolvable:$true] %s87_s20 }
  0x30   :  { %s2018_s11 = scalar_lea.vmem %s66_s16, 16  ;;  %s2022_s19 = scalar_lea.vmem %s66_s16, 32 }
  0x31   :  { %p2019_p6 = scmp.ne.s32.totalorder %s66_s16, %s2018_s11  ;;  %p2023_p7 = scmp.lt.s32.totalorder %s66_s16, %s66_s16 }
  0x32   :  { %p2024_p8 = scmp.lt.s32.totalorder %s2022_s19, %s2018_s11 }
  0x34   :  { %p2025_p9 = por %p2024_p8, %p2023_p7 }
  0x36   :  { %p2026_p10 = pnand %p2025_p9, %p2019_p6 }
  0x38   :  { %2029 = shalt.err (!%p2026_p10)
}
  0x39   :  { %68 = dma.hbm_to_vmem [thread:$0]  %s2616_s8, 16, %s66_s16, [#allocation6]  }
  0x3a   :  { %s2038_s23 = scalar_lea.vmem %s88_s20, 16  ;;  %s2042_s5 = scalar_lea.vmem %s88_s20, 32 }
  0x3b   :  { %p2039_p11 = scmp.ne.s32.totalorder %s88_s20, %s2038_s23  ;;  %p2043_p12 = scmp.lt.s32.totalorder %s88_s20, %s88_s20 }
  0x3c   :  { %p2044_p13 = scmp.lt.s32.totalorder %s2042_s5, %s2038_s23 }
  0x3e   :  { %p2045_p0 = por %p2044_p13, %p2043_p12 }
  0x40   :  { %p2046_p1 = pnand %p2045_p0, %p2039_p11 }
  0x42   :  { %2049 = shalt.err (!%p2046_p1)
}
  0x43   :  { %90 = dma.hbm_to_vmem [thread:$0]  %s2618_s10, 16, %s88_s20, [#allocation9]  }
  0x44   :  { %s2110_s6 = smov [#allocation13]  }
  0x45   :  { %s109_s26 = sshll.u32 %s2110_s6, 4  ;;  %s110_s26 = int_to_ptr.vmem [resolvable:$true] %s109_s26 }
  0x46   :  { %s2058_s27 = scalar_lea.vmem %s110_s26, 16  ;;  %s2062_s9 = scalar_lea.vmem %s110_s26, 32 }
  0x47   :  { %p2059_p2 = scmp.ne.s32.totalorder %s110_s26, %s2058_s27  ;;  %p2063_p3 = scmp.lt.s32.totalorder %s110_s26, %s110_s26 }
  0x48   :  { %p2064_p4 = scmp.lt.s32.totalorder %s2062_s9, %s2058_s27 }
  0x4a   :  { %p2065_p5 = por %p2064_p4, %p2063_p3 }
  0x4c   :  { %p2066_p6 = pnand %p2065_p5, %p2059_p2 }
  0x4e   :  { %2069 = shalt.err (!%p2066_p6)
}
  0x4f   :  { %112 = dma.hbm_to_vmem [thread:$0]  %s2620_s12, 16, %s110_s26, [#allocation12]  }
  0x50   :  { %2090 = dma.done.wait [#allocation3], 512  }
  0x51   :  { %2091 = vsyncadd [#allocation3], 4294966784 }
  0x52   :  { %2092 = dma.done.wait [#allocation6], 528  }
  0x53   :  { %2093 = vsyncadd [#allocation6], 4294966768 }
  0x54   :  { %2094 = dma.done.wait [#allocation9], 272  }
  0x55   :  { %2095 = vsyncadd [#allocation9], 4294967024 }
  0x56   :  { %2096 = dma.done.wait [#allocation12], 272  }
  0x57   :  { %2097 = vsyncadd [#allocation12], 4294967024  ;;  %v1849_v0 = vld [vmem:[%s2609_s1 + $0x18] sm:$0xff]   ;;  %v1850_v1 = vld [vmem:[%s2609_s1 + $0x10] sm:$0xff]   ;;  %vm230_vm0 = vcmask 523264   ;;  %vm159_vm1 = vcmask 261120  }
  0x58   :  { %1718 = vmatprep.subr.bf16.mxu0 %v1849_v0  ;;  %v1851_v2 = vld [vmem:[%s2609_s1 + $0x8] sm:$0xff]   ;;  %v1853_v3 = vld [vmem:[%s2608_s0] sm:$0xff]   ;;  %v2238_v7 = vld [vmem:[#allocation5 + $0x10] sm:$0xff]  ;;  %v2111_v36 = vmov 0   ;;  %s2112_s29 = smov 32  }
  0x59   :  { %1719 = vmatpush3.bf16.msra.mxu0 %v1849_v0  ;;  %v1852_v4 = vld [vmem:[%s2609_s1] sm:$0xff]   ;;  %1726 = vmatprep.mubr.msk.bf16.mxu0 %vm230_vm0, %v1853_v3  ;;  %v1854_v5 = vld [vmem:[%s2608_s0 + $0x8] sm:$0xff]   ;;  %v166_v9 = vsel %vm159_vm1, %v2238_v7, 0.0  ;;  %v2246_v11 = vld [vmem:[#allocation5 + $0x18] sm:$0xff] }
  0x5a   :  { %1720 = vmatprep.subr.bf16.mxu0 %v1850_v1  ;;  %v2234_v6 = vld [vmem:[#allocation5] sm:$0xff]  ;;  %v2244_v10 = vld [vmem:[#allocation5 + $0x8] sm:$0xff]  ;;  %167 = vadd.xlane.f32.xlu1 %v166_v9  ;;  %v169_v13 = vsel %vm159_vm1, %v2246_v11, 0.0  ;;  %v2297_v37 = vld [vmem:[#allocation2 + $0x18] sm:$0xff] }
  0x5b   :  { %1738 = vmatprep.mubr.msk.f32.mxu1 %vm159_vm1, %v2234_v6  ;;  %v160_v8 = vsel %vm159_vm1, %v2234_v6, 0.0  ;;  %v163_v12 = vsel %vm159_vm1, %v2244_v10, 0.0  ;;  %v1857_v30 = vld [vmem:[%s2611_s3 + $0x1c] ss:$12 sps:$4 sm:$0xff]   ;;  %v1855_v31 = vld [vmem:[%s2611_s3 + $0x18] ss:$12 sps:$4 sm:$0xff]  }
  0x5c   :  { %161 = vadd.xlane.f32.xlu0 %v160_v8  ;;  %v1860_v32 = vld [vmem:[%s2611_s3 + $0x4] ss:$12 sps:$4 sm:$0xff]   ;;  %v1861_v33 = vld [vmem:[%s2611_s3 + $0x20] ss:$12 sps:$4 sm:$0xff]   ;;  %v1862_v35 = vld [vmem:[%s2611_s3 + $0x8] ss:$12 sps:$4 sm:$0xff]  }
  0x5d   :  { %1721 = vmatpush3.bf16.msra.mxu0 %v1850_v1  ;;  %v1858_v34 = vld [vmem:[%s2611_s3] ss:$12 sps:$4 sm:$0xff]   ;;  %v2299_v38 = vld [vmem:[#allocation2 + $0x10] sm:$0xff]  ;;  %s2113_s3 = smov 96   ;;  %v2333_v42 = vld [vmem:[%s2612_s4 + $0x18] sm:$0xff] }
  0x5e   :  { %1722 = vmatprep.subr.bf16.mxu0 %v1851_v2  ;;  %170 = vadd.xlane.f32.xlu1 %v169_v13  ;;  %v2305_v39 = vld [vmem:[#allocation2] sm:$0xff]  ;;  %v2311_v40 = vld [vmem:[#allocation2 + $0x8] sm:$0xff]  ;;  %v2320_v41 = vld [vmem:[%s2612_s4 + $0x10] sm:$0xff] }
  0x5f   :  { %v2338_v43 = vld [vmem:[%s2612_s4] sm:$0xff]  ;;  %v2351_v44 = vld [vmem:[%s2612_s4 + $0x8] sm:$0xff]  ;;  %v2402_v9 = vld [vmem:[%s2610_s2 + $0x10] sm:$0xff] }
  0x60   :  { %164 = vadd.xlane.f32.xlu0 %v163_v12  ;;  %v2388_v1 = vld [vmem:[%s2610_s2] sm:$0xff]  ;;  %v2407_v12 = vld [vmem:[%s2610_s2 + $0x18] sm:$0xff] }
  0x61   :  { %1723 = vmatpush3.bf16.msra.mxu0 %v1851_v2  ;;  %v2393_v2 = vld [vmem:[%s2610_s2 + $0x8] sm:$0xff] }
  0x62   :  { %1724 = vmatprep.subr.bf16.mxu0 %v1852_v4 }
  0x65   :  { %1725 = vmatpush3.bf16.msra.mxu0 %v1852_v4 }
  0x66   :  { %1744 = vmatprep.subr.bf16.mxu0 %v1861_v33 }
  0x68   :  { %1727 = vmatmul.mubr.msk.bf16.vlgmr.msra.gmra.mxu0 %vm230_vm0, %v1854_v5 }
  0x69   :  { %1745 = vmatpush3.bf16.msra.mxu0 %v1861_v33 }
  0x6a   :  { %1746 = vmatprep.subr.bf16.mxu0 %v1862_v35 }
  0x6d   :  { %1747 = vmatpush3.bf16.msra.mxu0 %v1862_v35 }
  0xe3   :  { %v168_v46 = vpop.xlane.xlu1 %167 }
  0xe4   :  { %v174_v52 = vmul.f32 32.0, %v168_v46 }
  0xe5   :  { %v162_v45 = vpop.xlane.xlu0 %161 }
  0xe6   :  { %v172_v50 = vmul.f32 32.0, %v162_v45 }
  0xe7   :  { %v171_v49 = vpop.xlane.xlu1 %170 }
  0xe8   :  { %v175_v51 = vmul.f32 32.0, %v171_v49 }
  0xe9   :  { %v165_v47 = vpop.xlane.xlu0 %164 }
  0xea   :  { %v173_v48 = vmul.f32 32.0, %v165_v47 }
  0xec   :  { %1871 = vrcp.f32 %v173_v48 }
  0xed   :  { %1873 = vrcp.f32 %v172_v50 }
  0xee   :  { %1875 = vrcp.f32 %v175_v51 }
  0xef   :  { %1877 = vrcp.f32 %v174_v52 }
  0xf9   :  { %v2373_v53 = vpop.eup %1871 }
  0xfa   :  { %v2375_v54 = vpop.eup %1873 }
  0xfb   :  { %v2378_v57 = vpop.eup %1875 }
  0xfc   :  { %v2382_v62 = vpop.eup %1877 }
 0x128   :  { %v2252_v14 = vpop.f32.mrf.mxu0 }
 0x129   :  { %v288_v19 = vmul.f32 %v2252_v14, %v2252_v14 }
 0x12a   :  { %v2254_v15 = vpop.f32.mrf.mxu0 }
 0x12b   :  { %v286_v21 = vmul.f32 %v2254_v15, %v2254_v15  ;;  %v399_v4 = vmul.f32 %v2254_v15, %v2388_v1  ;;  %v401_v15 = vmul.f32 %v2252_v14, %v2402_v9 }
 0x12c   :  { %v2256_v16 = vpop.f32.mrf.mxu0 }
 0x12d   :  { %v289_v17 = vmul.f32 %v2256_v16, %v2256_v16 }
 0x12e   :  { %v2260_v18 = vpop.f32.mrf.mxu0 }
 0x12f   :  { %1730 = vmatprep.subr.mxu1 %v289_v17  ;;  %v287_v20 = vmul.f32 %v2260_v18, %v2260_v18  ;;  %v400_v5 = vmul.f32 %v2260_v18, %v2393_v2  ;;  %v402_v18 = vmul.f32 %v2256_v16, %v2407_v12 }
 0x130   :  { %1731 = vmatpush3.msra.mxu1 %v289_v17 }
 0x131   :  { %1732 = vmatprep.subr.mxu1 %v288_v19 }
 0x132   :  { %1733 = vmatpush3.msra.mxu1 %v288_v19 }
 0x133   :  { %1734 = vmatprep.subr.mxu1 %v287_v20 }
 0x134   :  { %1735 = vmatpush3.msra.mxu1 %v287_v20 }
 0x135   :  { %1736 = vmatprep.subr.mxu1 %v286_v21 }
 0x136   :  { %1737 = vmatpush3.msra.mxu1 %v286_v21 }
 0x137   :  { %1739 = vmatmul.mubr.msk.f32.vlgmr.msra.gmra.mxu1 %vm159_vm1, %v2244_v10  ;;  %475 = vmatprep.subr.bf16.mxu1 %v1857_v30 }
 0x138   :  { %1741 = vmatprep.mubr.msk.f32.mxu1 %vm159_vm1, %v2238_v7  ;;  %476 = vmatpush1.bf16.msra.mxu1 %v1855_v31 }
 0x139   :  { %477 = vmatprep.subr.bf16.mxu1 %v1860_v32 }
 0x13b   :  { %1742 = vmatmul.mubr.msk.f32.gmra.mxu1 %vm159_vm1, %v2246_v11 }
 0x13c   :  { %478 = vmatpush1.bf16.msra.mxu1 %v1858_v34  ;;  %495 = vmatprep.mubr.bf16.mxu1 %v2111_v36 }
 0x1f7   :  { %v1740_v22 = vpop.f32.mrf.mxu1 }
 0x1f8   :  { %v390_v23 = vsel %vm159_vm1, %v1740_v22, 0.0 }
 0x1f9   :  { %391 = vadd.xlane.f32.xlu1 %v390_v23  ;;  %v368_v24 = vpop.f32.mrf.mxu1 }
 0x1fa   :  { %v387_v25 = vsel %vm159_vm1, %v368_v24, 0.0 }
 0x1fb   :  { %v1743_v26 = vpop.f32.mrf.mxu1  ;;  %388 = vadd.xlane.f32.xlu0 %v387_v25 }
 0x1fc   :  { %v396_v27 = vsel %vm159_vm1, %v1743_v26, 0.0 }
 0x1fd   :  { %397 = vadd.xlane.f32.xlu1 %v396_v27  ;;  %v378_v28 = vpop.f32.mrf.mxu1 }
 0x1fe   :  { %v393_v29 = vsel %vm159_vm1, %v378_v28, 0.0 }
 0x1ff   :  { %394 = vadd.xlane.f32.xlu0 %v393_v29 }
 0x20e   :  { %810 = vrot.lane.b32.xlu1 %v2297_v37, %s2112_s29 }
 0x212   :  { %804 = vrot.lane.b32.xlu1 %v2305_v39, %s2112_s29 }
 0x215   :  { %808 = vrot.lane.b32.xlu0 %v2299_v38, %s2112_s29 }
 0x216   :  { %806 = vrot.lane.b32.xlu1 %v2311_v40, %s2112_s29 }
 0x219   :  { %750 = vrot.lane.b32.xlu0 %v2305_v39, %s2113_s3 }
 0x21a   :  { %752 = vrot.lane.b32.xlu1 %v2311_v40, %s2113_s3 }
 0x21d   :  { %754 = vrot.lane.b32.xlu0 %v2299_v38, %s2113_s3 }
 0x21e   :  { %756 = vrot.lane.b32.xlu1 %v2297_v37, %s2113_s3 }
 0x221   :  { %619 = vrot.lane.b32.xlu0 %v2320_v41, %s2104_s18 }
 0x222   :  { %621 = vrot.lane.b32.xlu1 %v2333_v42, %s2104_s18 }
 0x225   :  { %792 = vrot.lane.b32.xlu0 %v2320_v41, %s2113_s3 }
 0x226   :  { %794 = vrot.lane.b32.xlu1 %v2333_v42, %s2113_s3 }
 0x229   :  { %615 = vrot.lane.b32.xlu0 %v2338_v43, %s2104_s18 }
 0x22a   :  { %617 = vrot.lane.b32.xlu1 %v2351_v44, %s2104_s18 }
 0x22d   :  { %788 = vrot.lane.b32.xlu0 %v2338_v43, %s2113_s3 }
 0x22e   :  { %790 = vrot.lane.b32.xlu1 %v2351_v44, %s2113_s3 }
 0x231   :  { %573 = vrot.lane.b32.xlu0 %v2305_v39, %s2104_s18 }
 0x232   :  { %575 = vrot.lane.b32.xlu1 %v2311_v40, %s2104_s18 }
 0x235   :  { %734 = vrot.lane.b32.xlu0 %v2338_v43, %s2112_s29 }
 0x236   :  { %736 = vrot.lane.b32.xlu1 %v2351_v44, %s2112_s29 }
 0x239   :  { %577 = vrot.lane.b32.xlu0 %v2299_v38, %s2104_s18 }
 0x23a   :  { %579 = vrot.lane.b32.xlu1 %v2297_v37, %s2104_s18 }
 0x23d   :  { %738 = vrot.lane.b32.xlu0 %v2320_v41, %s2112_s29 }
 0x23e   :  { %740 = vrot.lane.b32.xlu1 %v2333_v42, %s2112_s29 }
 0x282   :  { %v392_v55 = vpop.xlane.xlu1 %391 }
 0x283   :  { %v404_v56 = vmul.f32 %v2373_v53, %v392_v55 }
 0x284   :  { %v389_v58 = vpop.xlane.xlu0 %388 }
 0x285   :  { %1879 = vrsqrt.f32 %v404_v56  ;;  %v403_v59 = vmul.f32 %v2375_v54, %v389_v58 }
 0x286   :  { %v398_v60 = vpop.xlane.xlu1 %397 }
 0x287   :  { %1881 = vrsqrt.f32 %v403_v59  ;;  %v406_v61 = vmul.f32 %v2378_v57, %v398_v60 }
 0x288   :  { %v395_v63 = vpop.xlane.xlu0 %394 }
 0x289   :  { %1883 = vrsqrt.f32 %v406_v61  ;;  %v405_v0 = vmul.f32 %v2382_v62, %v395_v63 }
 0x28a   :  { %v811_v25 = vpop.permute.xlu1 %810 }
 0x28b   :  { %1885 = vrsqrt.f32 %v405_v0 }
 0x28c   :  { %v809_v32 = vpop.permute.xlu0 %808 }
 0x292   :  { %v1880_v3 = vpop.eup %1879 }
 0x293   :  { %v2409_v13 = vmul.f32 %v1880_v3, %v400_v5 }
 0x294   :  { %v1882_v8 = vpop.eup %1881 }
 0x295   :  { %v2411_v17 = vmul.f32 %v1882_v8, %v399_v4 }
 0x296   :  { %v1884_v19 = vpop.eup %1883 }
 0x297   :  { %v415_v20 = vpack.c.bf16 %v2409_v13, %v2411_v17  ;;  %v2423_v23 = vmul.f32 %v1884_v19, %v402_v18 }
 0x298   :  { %v1886_v21 = vpop.eup %1885 }
 0x299   :  { %1625 = vmatmul.mubr.msk.bf16.vlgmr.msra.gmra.mxu1 %vm159_vm1, %v415_v20  ;;  %1748 = vmatprep.mubr.msk.bf16.mxu0 %vm159_vm1, %v415_v20  ;;  %v2421_v22 = vmul.f32 %v1886_v21, %v401_v15 }
 0x29a   :  { %505 = vmatprep.mubr.bf16.mxu1 %v2111_v36  ;;  %v805_v36 = vpop.permute.xlu1 %804 }
 0x29b   :  { %v416_v14 = vpack.c.bf16 %v2423_v23, %v2421_v22 }
 0x29d   :  { %1749 = vmatmul.mubr.msk.bf16.vlgmr.msra.gmra.mxu0 %vm159_vm1, %v416_v14 }
 0x29e   :  { %v807_v48 = vpop.permute.xlu1 %806 }
 0x2a1   :  { %1626 = vmatmul.mubr.msk.bf16.gmra.mxu1 %vm159_vm1, %v416_v14 }
 0x2a2   :  { %v753_v55 = vpop.permute.xlu1 %752 }
 0x2a6   :  { %v757_v61 = vpop.permute.xlu1 %756 }
 0x2aa   :  { %v622_v3 = vpop.permute.xlu1 %621 }
 0x2ae   :  { %v795_v5 = vpop.permute.xlu1 %794 }
 0x2b2   :  { %v618_v19 = vpop.permute.xlu1 %617 }
 0x2b6   :  { %v791_v18 = vpop.permute.xlu1 %790 }
 0x2ba   :  { %v576_v21 = vpop.permute.xlu1 %575 }
 0x359   :  { %v2430_v16 = vpop.f32.mrf.mxu1 }
 0x35b   :  { %v2432_v24 = vpop.f32.mrf.mxu1 }
 0x35d   :  { %v2434_v26 = vpop.f32.mrf.mxu1  ;;  %v1750_v27 = vpop.f32.mrf.mxu0 }
 0x35e   :  { %v633_v28 = vmul.f32 %v1750_v27, %v2299_v38  ;;  %v818_v34 = vmul.f32 %v1750_v27, %v809_v32 }
 0x35f   :  { %v2437_v29 = vpop.f32.mrf.mxu1  ;;  %v550_v30 = vpop.f32.mrf.mxu0 }
 0x360   :  { %v2441_v31 = vpack.c.bf16 %v2437_v29, %v2432_v24  ;;  %643 = vrot.lane.b32.xlu0 %v633_v28, %s2104_s18  ;;  %v631_v38 = vmul.f32 %v550_v30, %v2305_v39  ;;  %v816_v49 = vmul.f32 %v805_v36, %v550_v30 }
 0x361   :  { %v1751_v33 = vpop.f32.mrf.mxu0  ;;  %v2448_v46 = vpop.f32.mrf.mxu1 }
 0x362   :  { %v634_v35 = vmul.f32 %v1751_v33, %v2297_v37  ;;  %v819_v45 = vmul.f32 %v1751_v33, %v811_v25  ;;  %v751_v37 = vpop.permute.xlu0 %750  ;;  %v737_v25 = vpop.permute.xlu1 %736 }
 0x363   :  { %v553_v47 = vpop.f32.mrf.mxu0  ;;  %v2453_v51 = vpop.f32.mrf.mxu1  ;;  %v762_v52 = vmul.f32 %v751_v37, %v2432_v24 }
 0x364   :  { %828 = vrot.lane.b32.xlu0 %v818_v34, %s2104_s18  ;;  %645 = vrot.lane.b32.xlu1 %v634_v35, %s2104_s18  ;;  %v632_v50 = vmul.f32 %v553_v47, %v2311_v40  ;;  %v817_v39 = vmul.f32 %v807_v48, %v553_v47  ;;  %v763_v40 = vmul.f32 %v753_v55, %v2437_v29 }
 0x365   :  { %v2458_v56 = vpop.f32.mrf.mxu1 }
 0x366   :  { %v755_v58 = vpop.permute.xlu0 %754  ;;  %v580_v28 = vpop.permute.xlu1 %579  ;;  %v630_v35 = vmul.f32 %v622_v3, %v2458_v56 }
 0x367   :  { %v764_v59 = vmul.f32 %v755_v58, %v2453_v51  ;;  %v2464_v60 = vpop.f32.mrf.mxu1 }
 0x368   :  { %639 = vrot.lane.b32.xlu0 %v631_v38, %s2104_s18  ;;  %830 = vrot.lane.b32.xlu1 %v819_v45, %s2104_s18  ;;  %v765_v63 = vmul.f32 %v757_v61, %v2464_v60 }
 0x36a   :  { %v620_v0 = vpop.permute.xlu0 %619  ;;  %v741_v32 = vpop.permute.xlu1 %740 }
 0x36b   :  { %v629_v34 = vmul.f32 %v620_v0, %v2448_v46 }
 0x36c   :  { %824 = vrot.lane.b32.xlu0 %v816_v49, %s2104_s18  ;;  %641 = vrot.lane.b32.xlu1 %v632_v50, %s2104_s18  ;;  %v803_v49 = vmul.f32 %v795_v5, %v2458_v56 }
 0x36e   :  { %v793_v4 = vpop.permute.xlu0 %792 }
 0x36f   :  { %v802_v48 = vmul.f32 %v793_v4, %v2448_v46 }
 0x370   :  { %826 = vrot.lane.b32.xlu1 %v817_v39, %s2104_s18  ;;  %770 = vrot.lane.b32.xlu0 %v762_v52, %s2104_s18 }
 0x372   :  { %v616_v8 = vpop.permute.xlu0 %615 }
 0x373   :  { %v627_v58 = vmul.f32 %v616_v8, %v2430_v16  ;;  %v586_v8 = vmul.f32 %v576_v21, %v2437_v29 }
 0x374   :  { %772 = vrot.lane.b32.xlu1 %v763_v40, %s2104_s18  ;;  %774 = vrot.lane.b32.xlu0 %v764_v59, %s2104_s18  ;;  %v628_v59 = vmul.f32 %v618_v19, %v2434_v26 }
 0x376   :  { %v789_v15 = vpop.permute.xlu0 %788 }
 0x377   :  { %v800_v5 = vmul.f32 %v789_v15, %v2430_v16 }
 0x378   :  { %776 = vrot.lane.b32.xlu1 %v765_v63, %s2104_s18 }
 0x37a   :  { %v574_v20 = vpop.permute.xlu0 %573 }
 0x37b   :  { %v585_v61 = vmul.f32 %v574_v20, %v2432_v24 }
 0x37e   :  { %v735_v14 = vpop.permute.xlu0 %734 }
 0x37f   :  { %v746_v20 = vmul.f32 %v735_v14, %v2430_v16 }
 0x382   :  { %v578_v27 = vpop.permute.xlu0 %577 }
 0x383   :  { %v587_v15 = vmul.f32 %v578_v27, %v2453_v51 }
 0x386   :  { %v739_v30 = vpop.permute.xlu0 %738 }
 0x3d2   :  { %v644_v33 = vpop.permute.xlu0 %643 }
 0x3d3   :  { %v653_v45 = vadd.f32 %v644_v33, %v629_v34  ;;  %v801_v33 = vmul.f32 %v791_v18, %v2434_v26 }
 0x3d6   :  { %v829_v36 = vpop.permute.xlu0 %828  ;;  %v646_v38 = vpop.permute.xlu1 %645 }
 0x3d7   :  { %v654_v47 = vadd.f32 %v646_v38, %v630_v35  ;;  %v838_v52 = vadd.f32 %v829_v36, %v802_v48 }
 0x3d9   :  { %v656_v50 = vpack.c.bf16 %v654_v47, %v653_v45  ;;  %v747_v45 = vmul.f32 %v737_v25, %v2434_v26 }
 0x3da   :  { %v640_v37 = vpop.permute.xlu0 %639  ;;  %v831_v39 = vpop.permute.xlu1 %830 }
 0x3db   :  { %v839_v55 = vadd.f32 %v831_v39, %v803_v49  ;;  %661 = vrot.lane.b32.xlu0 %v656_v50, %s2104_s18  ;;  %v651_v3 = vadd.f32 %v640_v37, %v627_v58  ;;  %v748_v49 = vmul.f32 %v739_v30, %v2448_v46  ;;  %v749_v50 = vmul.f32 %v741_v32, %v2458_v56 }
 0x3dc   :  { %v588_v37 = vmul.f32 %v580_v28, %v2464_v60  ;;  %v565_v58 = vmul.f32 %v2430_v16, %v2338_v43 }
 0x3dd   :  { %v841_v40 = vpack.c.bf16 %v839_v55, %v838_v52 }
 0x3de   :  { %v825_v63 = vpop.permute.xlu0 %824  ;;  %v642_v0 = vpop.permute.xlu1 %641 }
 0x3df   :  { %v652_v4 = vadd.f32 %v642_v0, %v628_v59  ;;  %593 = vrot.lane.b32.xlu0 %v585_v61, %s2104_s18  ;;  %852 = vrot.lane.b32.xlu1 %v841_v40, %s2112_s29  ;;  %v836_v19 = vadd.f32 %v825_v63, %v800_v5  ;;  %v566_v40 = vmul.f32 %v2434_v26, %v2351_v44 }
 0x3e0   :  { %v2506_v63 = vpack.c.bf16 %v2464_v60, %v2453_v51  ;;  %v567_v26 = vmul.f32 %v2448_v46, %v2320_v41  ;;  %v568_v51 = vmul.f32 %v2458_v56, %v2333_v42  ;;  %v1605_v41 = vadd.f32 -1.0, %v2238_v7 }
 0x3e1   :  { %v655_v34 = vpack.c.bf16 %v652_v4, %v651_v3  ;;  %v1603_v42 = vadd.f32 -1.0, %v2234_v6  ;;  %v1606_v56 = vadd.f32 -1.0, %v2246_v11 }
 0x3e2   :  { %v827_v35 = vpop.permute.xlu1 %826  ;;  %v771_v36 = vpop.permute.xlu0 %770  ;;  %v157_v46 = vmul.f32 1e+30, %v1605_v41 }
 0x3e3   :  { %v837_v38 = vadd.f32 %v827_v35, %v801_v33  ;;  %659 = vrot.lane.b32.xlu0 %v655_v34, %s2104_s18  ;;  %595 = vrot.lane.b32.xlu1 %v586_v8, %s2104_s18  ;;  %v782_v18 = vadd.f32 %v771_v36, %v746_v20  ;;  %v155_v20 = vmul.f32 1e+30, %v1603_v42 }
 0x3e5   :  { %v840_v24 = vpack.c.bf16 %v837_v38, %v836_v19 }
 0x3e6   :  { %v773_v47 = vpop.permute.xlu1 %772  ;;  %v775_v29 = vpop.permute.xlu0 %774 }
 0x3e7   :  { %v783_v48 = vadd.f32 %v773_v47, %v747_v45  ;;  %597 = vrot.lane.b32.xlu0 %v587_v15, %s2104_s18  ;;  %850 = vrot.lane.b32.xlu1 %v840_v24, %s2112_s29  ;;  %v784_v39 = vadd.f32 %v775_v29, %v748_v49  ;;  %v1604_v45 = vadd.f32 -1.0, %v2244_v10  ;;  %v158_v29 = vmul.f32 1e+30, %v1606_v56 }
 0x3e9   :  { %v786_v21 = vpack.c.bf16 %v783_v48, %v782_v18 }
 0x3ea   :  { %v777_v14 = vpop.permute.xlu1 %776 }
 0x3eb   :  { %v785_v25 = vadd.f32 %v777_v14, %v749_v50  ;;  %844 = vrot.lane.b32.xlu0 %v786_v21, %s2113_s3  ;;  %599 = vrot.lane.b32.xlu1 %v588_v37, %s2104_s18 }
 0x3ed   :  { %v787_v27 = vpack.c.bf16 %v785_v25, %v784_v39  ;;  %v156_v39 = vmul.f32 1e+30, %v1604_v45 }
 0x3ef   :  { %846 = vrot.lane.b32.xlu1 %v787_v27, %s2113_s3 }
 0x44d   :  { %v662_v52 = vpop.permute.xlu0 %661 }
 0x44e   :  { %v673_v55 = vsel %vm159_vm1, %v662_v52, 0  ;;  %1830 = vmatprep.subr.msk.bf16.mxu1 %vm159_vm1, %v662_v52 }
 0x44f   :  { %1753 = vmatpush3.bf16.xpose.msra.mxu1 %v673_v55 }
 0x451   :  { %v594_v30 = vpop.permute.xlu0 %593  ;;  %v853_v32 = vpop.permute.xlu1 %852 }
 0x452   :  { %v864_v28 = vsel %vm159_vm1, %v853_v32, 0  ;;  %1832 = vmatprep.subr.msk.bf16.mxu0 %vm159_vm1, %v853_v32  ;;  %v605_v0 = vadd.f32 %v594_v30, %v565_v58 }
 0x453   :  { %1761 = vmatpush3.bf16.xpose.msra.mxu0 %v864_v28 }
 0x455   :  { %v660_v59 = vpop.permute.xlu0 %659  ;;  %v596_v61 = vpop.permute.xlu1 %595 }
 0x456   :  { %v670_v3 = vsel %vm159_vm1, %v660_v59, 0  ;;  %v606_v4 = vadd.f32 %v596_v61, %v566_v40  ;;  %1831 = vmatprep.subr.msk.bf16.mxu1 %vm159_vm1, %v660_v59 }
 0x457   :  { %1755 = vmatpush3.bf16.xpose.msra.mxu1 %v670_v3 }
 0x458   :  { %v609_v5 = vpack.c.bf16 %v606_v4, %v605_v0  ;;  %1768 = vmatprep.subr.bf16.mxu1 %v2506_v63 }
 0x459   :  { %v598_v43 = vpop.permute.xlu0 %597  ;;  %v851_v16 = vpop.permute.xlu1 %850 }
 0x45a   :  { %v861_v44 = vsel %vm159_vm1, %v851_v16, 0  ;;  %1756 = vmatprep.mubr.msk.bf16.mxu1 %vm159_vm1, %v609_v5  ;;  %1833 = vmatprep.subr.msk.bf16.mxu0 %vm159_vm1, %v851_v16  ;;  %v607_v34 = vadd.f32 %v598_v43, %v567_v26 }
 0x45b   :  { %1763 = vmatpush3.bf16.xpose.msra.mxu0 %v861_v44 }
 0x45d   :  { %v845_v60 = vpop.permute.xlu0 %844  ;;  %v600_v33 = vpop.permute.xlu1 %599 }
 0x45e   :  { %v608_v8 = vadd.f32 %v600_v33, %v568_v51  ;;  %1764 = vmatprep.mubr.msk.bf16.mxu0 %vm159_vm1, %v845_v60 }
 0x460   :  { %v610_v35 = vpack.c.bf16 %v608_v8, %v607_v34 }
 0x461   :  { %v847_v36 = vpop.permute.xlu1 %846 }
 0x462   :  { %1757 = vmatmul.mubr.msk.bf16.vlgmr.msra.gmra.mxu1 %vm159_vm1, %v610_v35  ;;  %1765 = vmatmul.mubr.msk.bf16.vlgmr.msra.gmra.mxu0 %vm159_vm1, %v847_v36 }
 0x463   :  { %1769 = vmatpush3.bf16.msra.mxu1 %v2506_v63 }
 0x464   :  { %1770 = vmatprep.subr.bf16.mxu1 %v2441_v31 }
 0x467   :  { %1771 = vmatpush3.bf16.msra.mxu1 %v2441_v31 }
 0x522   :  { %v1758_v19 = vpop.f32.mrf.mxu1  ;;  %v1766_v38 = vpop.f32.mrf.mxu0 }
 0x523   :  { %v726_v24 = vmul.f32 0.17677669, %v1758_v19  ;;  %v917_v40 = vmul.f32 0.17677669, %v1766_v38 }
 0x524   :  { %v709_v15 = vpop.f32.mrf.mxu1  ;;  %v900_v47 = vpop.f32.mrf.mxu0 }
 0x525   :  { %v724_v18 = vmul.f32 0.17677669, %v709_v15  ;;  %v730_v48 = vadd.f32 %v726_v24, %v157_v46  ;;  %v915_v21 = vmul.f32 0.17677669, %v900_v47  ;;  %v921_v43 = vadd.f32 %v917_v40, %v157_v46 }
 0x526   :  { %v1759_v49 = vpop.f32.mrf.mxu1  ;;  %v1767_v50 = vpop.f32.mrf.mxu0 }
 0x527   :  { %v727_v7 = vmul.f32 0.17677669, %v1759_v49  ;;  %v929_v37 = vsel %vm159_vm1, %v730_v48, -inf  ;;  %v728_v14 = vadd.f32 %v724_v18, %v155_v20  ;;  %v918_v55 = vmul.f32 0.17677669, %v1767_v50 }
 0x528   :  { %930 = vmax.xlane.f32.xlu0 %v929_v37  ;;  %v712_v11 = vpop.f32.mrf.mxu1  ;;  %v903_v25 = vpop.f32.mrf.mxu0  ;;  %v919_v10 = vadd.f32 %v915_v21, %v155_v20  ;;  %v941_v16 = vsel %vm159_vm1, %v921_v43, -inf }
 0x529   :  { %v725_v27 = vmul.f32 0.17677669, %v712_v11  ;;  %v731_v52 = vadd.f32 %v727_v7, %v158_v29  ;;  %v916_v30 = vmul.f32 0.17677669, %v903_v25  ;;  %v923_v32 = vsel %vm159_vm1, %v728_v14, -inf }
 0x52a   :  { %v935_v61 = vsel %vm159_vm1, %v919_v10, -inf  ;;  %v922_v0 = vadd.f32 %v918_v55, %v158_v29 }
 0x52b   :  { %v932_v28 = vsel %vm159_vm1, %v731_v52, -inf  ;;  %v729_v58 = vadd.f32 %v725_v27, %v156_v39  ;;  %v920_v3 = vadd.f32 %v916_v30, %v156_v39 }
 0x52c   :  { %924 = vmax.xlane.f32.xlu0 %v923_v32  ;;  %933 = vmax.xlane.f32.xlu1 %v932_v28  ;;  %v944_v4 = vsel %vm159_vm1, %v922_v0, -inf }
 0x52d   :  { %v926_v59 = vsel %vm159_vm1, %v729_v58, -inf  ;;  %v938_v5 = vsel %vm159_vm1, %v920_v3, -inf }
 0x530   :  { %927 = vmax.xlane.f32.xlu1 %v926_v59  ;;  %936 = vmax.xlane.f32.xlu0 %v935_v61 }
 0x534   :  { %945 = vmax.xlane.f32.xlu1 %v944_v4  ;;  %939 = vmax.xlane.f32.xlu0 %v938_v5 }
 0x538   :  { %942 = vmax.xlane.f32.xlu0 %v941_v16 }
 0x5b1   :  { %v931_v44 = vpop.xlane.xlu0 %930 }
 0x5b2   :  { %v949_v26 = vsub.f32 %v730_v48, %v931_v44 }
 0x5b4   :  { %v959_v51 = vmul.f32 1.442695, %v949_v26 }
 0x5b5   :  { %v925_v60 = vpop.xlane.xlu0 %924  ;;  %v934_v33 = vpop.xlane.xlu1 %933 }
 0x5b6   :  { %1887 = vpow2.f32 %v959_v51  ;;  %v950_v34 = vsub.f32 %v731_v52, %v934_v33  ;;  %v947_v19 = vsub.f32 %v728_v14, %v925_v60 }
 0x5b8   :  { %v961_v8 = vmul.f32 1.442695, %v950_v34  ;;  %v955_v18 = vmul.f32 1.442695, %v947_v19 }
 0x5b9   :  { %v937_v35 = vpop.xlane.xlu0 %936  ;;  %v928_v36 = vpop.xlane.xlu1 %927 }
 0x5ba   :  { %1889 = vpow2.f32 %v961_v8  ;;  %v948_v41 = vsub.f32 %v729_v58, %v928_v36  ;;  %v951_v48 = vsub.f32 %v919_v10, %v937_v35 }
 0x5bc   :  { %v957_v24 = vmul.f32 1.442695, %v948_v41  ;;  %v963_v7 = vmul.f32 1.442695, %v951_v48  ;;  %v1865_v48 = vld [vmem:[%s2615_s7] sm:$0xff]  }
 0x5bd   :  { %v940_v42 = vpop.xlane.xlu0 %939  ;;  %v946_v56 = vpop.xlane.xlu1 %945 }
 0x5be   :  { %v954_v46 = vsub.f32 %v922_v0, %v946_v56  ;;  %v952_v20 = vsub.f32 %v920_v3, %v940_v42 }
 0x5c0   :  { %v969_v38 = vmul.f32 1.442695, %v954_v46  ;;  %v965_v49 = vmul.f32 1.442695, %v952_v20 }
 0x5c1   :  { %v943_v45 = vpop.xlane.xlu0 %942 }
 0x5c2   :  { %v953_v15 = vsub.f32 %v921_v43, %v943_v45  ;;  %1891 = vpow2.f32 %v969_v38 }
 0x5c3   :  { %v2536_v47 = vpop.eup %1887  ;;  %1893 = vpow2.f32 %v957_v24 }
 0x5c4   :  { %v967_v29 = vmul.f32 1.442695, %v953_v15  ;;  %v977_v21 = vsel %vm159_vm1, %v2536_v47, 0.0 }
 0x5c5   :  { %978 = vadd.xlane.f32.xlu0 %v977_v21 }
 0x5c6   :  { %1895 = vpow2.f32 %v967_v29  ;;  %v1866_v29 = vld [vmem:[%s2615_s7 + $0x10] sm:$0xff]  }
 0x5c7   :  { %v1890_v50 = vpop.eup %1889  ;;  %1897 = vpow2.f32 %v955_v18  ;;  %v1864_v18 = vld [vmem:[%s2615_s7 + $0x18] sm:$0xff]  }
 0x5c8   :  { %1899 = vpow2.f32 %v965_v49  ;;  %v980_v37 = vsel %vm159_vm1, %v1890_v50, 0.0  ;;  %1784 = vmatprep.subr.bf16.mxu1 %v1864_v18 }
 0x5c9   :  { %981 = vadd.xlane.f32.xlu1 %v980_v37  ;;  %1901 = vpow2.f32 %v963_v7 }
 0x5cf   :  { %v1892_v14 = vpop.eup %1891 }
 0x5d0   :  { %v992_v39 = vsel %vm159_vm1, %v1892_v14, 0.0  ;;  %v1894_v11 = vpop.eup %1893 }
 0x5d1   :  { %993 = vadd.xlane.f32.xlu1 %v992_v39  ;;  %v974_v55 = vsel %vm159_vm1, %v1894_v11, 0.0 }
 0x5d3   :  { %v1896_v25 = vpop.eup %1895 }
 0x5d4   :  { %v989_v27 = vsel %vm159_vm1, %v1896_v25, 0.0  ;;  %v1898_v52 = vpop.eup %1897 }
 0x5d5   :  { %990 = vadd.xlane.f32.xlu0 %v989_v27  ;;  %v1900_v10 = vpop.eup %1899  ;;  %975 = vadd.xlane.f32.xlu1 %v974_v55  ;;  %v971_v30 = vsel %vm159_vm1, %v1898_v52, 0.0 }
 0x5d6   :  { %v1902_v32 = vpop.eup %1901  ;;  %v986_v28 = vsel %vm159_vm1, %v1900_v10, 0.0 }
 0x5d7   :  { %v983_v58 = vsel %vm159_vm1, %v1902_v32, 0.0 }
 0x5d9   :  { %972 = vadd.xlane.f32.xlu0 %v971_v30  ;;  %987 = vadd.xlane.f32.xlu1 %v986_v28 }
 0x5dd   :  { %984 = vadd.xlane.f32.xlu0 %v983_v58 }
 0x5ea   :  { %1078 = vrot.lane.b32.xlu1 %v2441_v31, %s2113_s3 }
 0x5f3   :  { %1080 = vrot.lane.b32.xlu0 %v2506_v63, %s2113_s3 }
 0x64e   :  { %v979_v59 = vpop.xlane.xlu0 %978 }
 0x652   :  { %v982_v40 = vpop.xlane.xlu1 %981 }
 0x653   :  { %1903 = vrcp.f32 %v982_v40 }
 0x65a   :  { %v994_v61 = vpop.xlane.xlu1 %993 }
 0x65e   :  { %v991_v0 = vpop.xlane.xlu0 %990  ;;  %v976_v3 = vpop.xlane.xlu1 %975 }
 0x65f   :  { %1905 = vrcp.f32 %v976_v3 }
 0x660   :  { %1907 = vrcp.f32 %v979_v59  ;;  %v1904_v63 = vpop.eup %1903 }
 0x661   :  { %v1006_v60 = vmul.f32 %v1904_v63, %v1890_v50 }
 0x662   :  { %v973_v4 = vpop.xlane.xlu0 %972  ;;  %v988_v5 = vpop.xlane.xlu1 %987 }
 0x663   :  { %1909 = vrcp.f32 %v973_v4  ;;  %v1645_v4 = vld [vmem:[#allocation7] ss:$0 sm:$0xff] }
 0x664   :  { %1911 = vrcp.f32 %v991_v0 }
 0x665   :  { %1913 = vrcp.f32 %v988_v5 }
 0x666   :  { %1915 = vrcp.f32 %v994_v61  ;;  %v985_v43 = vpop.xlane.xlu0 %984  ;;  %v1079_v16 = vpop.permute.xlu1 %1078 }
 0x667   :  { %1917 = vrcp.f32 %v985_v43 }
 0x66a   :  { %v1081_v31 = vpop.permute.xlu0 %1080 }
 0x66b   :  { %1776 = vmatprep.subr.bf16.mxu0 %v1081_v31 }
 0x66c   :  { %1777 = vmatpush3.bf16.msra.mxu0 %v1081_v31  ;;  %v1906_v44 = vpop.eup %1905 }
 0x66d   :  { %1778 = vmatprep.subr.bf16.mxu0 %v1079_v16  ;;  %v1908_v26 = vpop.eup %1907  ;;  %v1004_v8 = vmul.f32 %v1906_v44, %v1894_v11 }
 0x66e   :  { %v1005_v36 = vmul.f32 %v1908_v26, %v2536_v47  ;;  %v1863_v47 = vld [vmem:[%s2615_s7 + $0x8] sm:$0xff]   ;;  %s2114_s7 = smov [#allocation14]  }
 0x66f   :  { %s1588_s10 = sshll.u32 %s2114_s7, 4  ;;  %s1589_s10 = int_to_ptr.vmem [resolvable:$true] %s1588_s10 }
 0x670   :  { %v1910_v51 = vpop.eup %1909  ;;  %1779 = vmatpush3.bf16.msra.mxu0 %v1079_v16  ;;  %v1012_v46 = vpack.c.bf16 %v1006_v60, %v1005_v36  ;;  %s2070_s29 = scalar_lea.vmem %s1589_s10, 512  ;;  %p2075_p8 = scmp.lt.s32.totalorder %s1589_s10, %s1589_s10 }
 0x671   :  { %v1912_v33 = vpop.eup %1911  ;;  %v1003_v34 = vmul.f32 %v1910_v51, %v1898_v52  ;;  %1792 = vmatprep.subr.bf16.mxu0 %v1863_v47  ;;  %p2071_p7 = scmp.ne.s32.totalorder %s1589_s10, %s2070_s29  ;;  %p2076_p9 = scmp.lt.s32.totalorder %s2070_s29, %s2070_s29 }
 0x672   :  { %v1914_v35 = vpop.eup %1913  ;;  %v1009_v19 = vmul.f32 %v1912_v33, %v1896_v25 }
 0x673   :  { %v1916_v41 = vpop.eup %1915  ;;  %v1011_v42 = vpack.c.bf16 %v1004_v8, %v1003_v34  ;;  %v1008_v24 = vmul.f32 %v1914_v35, %v1900_v10  ;;  %v1929_v8 = vld [vmem:[#allocation5 + $0x18] sm:$0xff]  ;;  %p2077_p10 = por %p2076_p9, %p2075_p8 }
 0x674   :  { %v1918_v56 = vpop.eup %1917  ;;  %v1010_v20 = vmul.f32 %v1916_v41, %v1892_v14 }
 0x675   :  { %1772 = vmatprep.mubr.msk.bf16.mxu1 %vm159_vm1, %v1011_v42  ;;  %v1007_v38 = vmul.f32 %v1918_v56, %v1902_v32  ;;  %p2078_p11 = pnand %p2077_p10, %p2071_p7 }
 0x676   :  { %1773 = vmatmul.mubr.msk.bf16.vlgmr.msra.gmra.mxu1 %vm159_vm1, %v1012_v46  ;;  %v1014_v15 = vpack.c.bf16 %v1010_v20, %v1009_v19  ;;  %v1868_v20 = vld [vmem:[#allocation8] sm:$0xff]  }
 0x677   :  { %v1013_v45 = vpack.c.bf16 %v1008_v24, %v1007_v38  ;;  %1785 = vmatpush3.bf16.msra.mxu1 %v1864_v18  ;;  %v1867_v24 = vld [vmem:[#allocation8 + $0x8] sm:$0xff]  }
 0x678   :  { %1786 = vmatprep.subr.bf16.mxu1 %v1866_v29 }
 0x679   :  { %1780 = vmatprep.mubr.msk.bf16.mxu0 %vm159_vm1, %v1013_v45 }
 0x67a   :  { %1781 = vmatmul.mubr.msk.bf16.vlgmr.msra.gmra.mxu0 %vm159_vm1, %v1014_v15 }
 0x67b   :  { %1793 = vmatpush3.bf16.msra.mxu0 %v1863_v47  ;;  %1787 = vmatpush3.bf16.msra.mxu1 %v1866_v29 }
 0x67c   :  { %1794 = vmatprep.subr.bf16.mxu0 %v1865_v48 }
 0x67f   :  { %1795 = vmatpush3.bf16.msra.mxu0 %v1865_v48 }
 0x680   :  { %1814 = vmatprep.subr.bf16.mxu0 %v1867_v24 }
 0x736   :  { %v1774_v21 = vpop.f32.mrf.mxu1 }
 0x738   :  { %v1055_v49 = vpop.f32.mrf.mxu1 }
 0x73a   :  { %v1775_v50 = vpop.f32.mrf.mxu1  ;;  %v1782_v7 = vpop.f32.mrf.mxu0 }
 0x73b   :  { %v1071_v11 = vpack.c.bf16 %v1775_v50, %v1774_v21 }
 0x73c   :  { %v1058_v37 = vpop.f32.mrf.mxu1  ;;  %v1124_v14 = vpop.f32.mrf.mxu0 }
 0x73d   :  { %v1070_v39 = vpack.c.bf16 %v1058_v37, %v1055_v49 }
 0x73e   :  { %v1783_v25 = vpop.f32.mrf.mxu0 }
 0x73f   :  { %1796 = vmatprep.mubr.msk.bf16.mxu0 %vm159_vm1, %v1070_v39  ;;  %v1140_v55 = vpack.c.bf16 %v1783_v25, %v1782_v7 }
 0x740   :  { %v1127_v27 = vpop.f32.mrf.mxu0  ;;  %1797 = vmatmul.mubr.msk.bf16.vlgmr.msra.gmra.mxu0 %vm159_vm1, %v1071_v11 }
 0x741   :  { %v1139_v52 = vpack.c.bf16 %v1127_v27, %v1124_v14  ;;  %1815 = vmatpush3.bf16.msra.mxu0 %v1867_v24 }
 0x742   :  { %1816 = vmatprep.subr.bf16.mxu0 %v1868_v20 }
 0x743   :  { %1788 = vmatprep.mubr.msk.bf16.mxu1 %vm159_vm1, %v1139_v52 }
 0x744   :  { %1789 = vmatmul.mubr.msk.bf16.vlgmr.msra.gmra.mxu1 %vm159_vm1, %v1140_v55 }
 0x745   :  { %1808 = vmatprep.mubr.msk.f32.mxu1 %vm159_vm1, %v2234_v6  ;;  %1817 = vmatpush3.bf16.msra.mxu0 %v1868_v20 }
 0x800   :  { %v1798_v10 = vpop.f32.mrf.mxu0 }
 0x802   :  { %v1264_v30 = vpop.f32.mrf.mxu0 }
 0x804   :  { %v1790_v32 = vpop.f32.mrf.mxu1  ;;  %v1799_v58 = vpop.f32.mrf.mxu0 }
 0x805   :  { %v1273_v28 = vadd.f32 %v1798_v10, %v1790_v32  ;;  %v1650_v10 = vld [vmem:[#allocation10] ss:$0 sm:$0xff] }
 0x806   :  { %v1197_v40 = vpop.f32.mrf.mxu1  ;;  %v1267_v5 = vpop.f32.mrf.mxu0 }
 0x807   :  { %v1281_v61 = vadd.f32 %v1273_v28, %v2421_v22  ;;  %v1265_v0 = vadd.f32 %v1264_v30, %v1197_v40 }
 0x808   :  { %v1791_v59 = vpop.f32.mrf.mxu1 }
 0x809   :  { %v1276_v3 = vadd.f32 %v1799_v58, %v1791_v59  ;;  %v2576_v63 = vadd.f32 %v1645_v4, %v1281_v61  ;;  %v1279_v6 = vadd.f32 %v1265_v0, %v2411_v17  ;;  %v1927_v17 = vld [vmem:[#allocation5 + $0x8] sm:$0xff] }
 0x80a   :  { %v1200_v43 = vpop.f32.mrf.mxu1 }
 0x80b   :  { %v1282_v31 = vadd.f32 %v1276_v3, %v2423_v23  ;;  %v1268_v16 = vadd.f32 %v1267_v5, %v1200_v43  ;;  %v1290_v33 = vadd.f32 %v1645_v4, %v1279_v6  ;;  %v1296_v22 = vmul.f32 %v2576_v63, %v2576_v63 }
 0x80c   :  { %v1397_v27 = vmul.f32 %v2576_v63, %v2402_v9 }
 0x80d   :  { %v1293_v44 = vadd.f32 %v1645_v4, %v1282_v31  ;;  %v1280_v26 = vadd.f32 %v1268_v16, %v2409_v13  ;;  %v1294_v23 = vmul.f32 %v1290_v33, %v1290_v33  ;;  %v1928_v13 = vld [vmem:[#allocation5 + $0x10] sm:$0xff]  ;;  %v1395_v7 = vmul.f32 %v1290_v33, %v2388_v1  ;;  %v1869_v1 = vld [vmem:[#allocation11 + $0x8] sm:$0xff]  }
 0x80f   :  { %v1291_v51 = vadd.f32 %v1645_v4, %v1280_v26  ;;  %v1297_v60 = vmul.f32 %v1293_v44, %v1293_v44  ;;  %v1398_v11 = vmul.f32 %v1293_v44, %v2407_v12  ;;  %v1655_v44 = vld [vmem:[#allocation13] ss:$0 sm:$0xff] }
 0x811   :  { %1800 = vmatprep.subr.mxu1 %v1297_v60  ;;  %v1295_v34 = vmul.f32 %v1291_v51, %v1291_v51  ;;  %v1396_v37 = vmul.f32 %v1291_v51, %v2393_v2  ;;  %v1870_v2 = vld [vmem:[#allocation11] sm:$0xff]  }
 0x812   :  { %1801 = vmatpush3.msra.mxu1 %v1297_v60 }
 0x813   :  { %1802 = vmatprep.subr.mxu1 %v1296_v22 }
 0x814   :  { %1803 = vmatpush3.msra.mxu1 %v1296_v22 }
 0x815   :  { %1804 = vmatprep.subr.mxu1 %v1295_v34 }
 0x816   :  { %1805 = vmatpush3.msra.mxu1 %v1295_v34 }
 0x817   :  { %1806 = vmatprep.subr.mxu1 %v1294_v23 }
 0x818   :  { %1807 = vmatpush3.msra.mxu1 %v1294_v23 }
 0x819   :  { %1809 = vmatmul.mubr.msk.f32.vlgmr.msra.gmra.mxu1 %vm159_vm1, %v1927_v17  ;;  %1822 = vmatprep.subr.bf16.mxu1 %v1869_v1 }
 0x81a   :  { %1811 = vmatprep.mubr.msk.f32.mxu1 %vm159_vm1, %v1928_v13  ;;  %1823 = vmatpush3.bf16.msra.mxu1 %v1869_v1 }
 0x81b   :  { %1824 = vmatprep.subr.bf16.mxu1 %v1870_v2 }
 0x81d   :  { %1812 = vmatmul.mubr.msk.f32.gmra.mxu1 %vm159_vm1, %v1929_v8 }
 0x81e   :  { %1825 = vmatpush3.bf16.msra.mxu1 %v1870_v2 }
 0x8d9   :  { %v1810_v35 = vpop.f32.mrf.mxu1 }
 0x8da   :  { %v1386_v36 = vsel %vm159_vm1, %v1810_v35, 0.0 }
 0x8db   :  { %1387 = vadd.xlane.f32.xlu0 %v1386_v36  ;;  %v1364_v41 = vpop.f32.mrf.mxu1 }
 0x8dc   :  { %v1383_v42 = vsel %vm159_vm1, %v1364_v41, 0.0 }
 0x8dd   :  { %1384 = vadd.xlane.f32.xlu1 %v1383_v42  ;;  %v1813_v56 = vpop.f32.mrf.mxu1 }
 0x8de   :  { %v1392_v19 = vsel %vm159_vm1, %v1813_v56, 0.0 }
 0x8df   :  { %v1374_v46 = vpop.f32.mrf.mxu1 }
 0x8e0   :  { %v1389_v38 = vsel %vm159_vm1, %v1374_v46, 0.0 }
 0x8e1   :  { %1393 = vadd.xlane.f32.xlu1 %v1392_v19  ;;  %1390 = vadd.xlane.f32.xlu0 %v1389_v38 }
 0x964   :  { %v1388_v45 = vpop.xlane.xlu0 %1387 }
 0x965   :  { %v1400_v15 = vmul.f32 %v2373_v53, %v1388_v45 }
 0x966   :  { %v1385_v47 = vpop.xlane.xlu1 %1384 }
 0x967   :  { %1919 = vrsqrt.f32 %v1400_v15  ;;  %v1399_v18 = vmul.f32 %v2375_v54, %v1385_v47 }
 0x969   :  { %1921 = vrsqrt.f32 %v1399_v18 }
 0x96a   :  { %v1394_v48 = vpop.xlane.xlu1 %1393  ;;  %v1391_v29 = vpop.xlane.xlu0 %1390 }
 0x96b   :  { %v1402_v21 = vmul.f32 %v2378_v57, %v1394_v48  ;;  %v1401_v49 = vmul.f32 %v2382_v62, %v1391_v29 }
 0x96d   :  { %1923 = vrsqrt.f32 %v1402_v21 }
 0x96e   :  { %1925 = vrsqrt.f32 %v1401_v49 }
 0x974   :  { %v1920_v50 = vpop.eup %1919 }
 0x975   :  { %v1408_v39 = vmul.f32 %v1920_v50, %v1396_v37 }
 0x976   :  { %v1922_v14 = vpop.eup %1921 }
 0x977   :  { %v1407_v53 = vmul.f32 %v1922_v14, %v1395_v7 }
 0x979   :  { %v1411_v54 = vpack.c.bf16 %v1408_v39, %v1407_v53 }
 0x97a   :  { %v1924_v25 = vpop.eup %1923 }
 0x97b   :  { %v1926_v57 = vpop.eup %1925  ;;  %1818 = vmatprep.mubr.msk.bf16.mxu0 %vm159_vm1, %v1411_v54  ;;  %v1410_v62 = vmul.f32 %v1924_v25, %v1398_v11 }
 0x97c   :  { %v1409_v52 = vmul.f32 %v1926_v57, %v1397_v27 }
 0x97e   :  { %v1412_v55 = vpack.c.bf16 %v1410_v62, %v1409_v52 }
 0x980   :  { %1819 = vmatmul.mubr.msk.bf16.vlgmr.msra.gmra.mxu0 %vm159_vm1, %v1412_v55 }
 0xa40   :  { %v1820_v12 = vpop.f32.mrf.mxu0 }
 0xa41   :  { %v1485_v28 = vadd.f32 %v1820_v12, %v1650_v10 }
 0xa42   :  { %v1476_v30 = vpop.f32.mrf.mxu0 }
 0xa43   :  { %v1477_v32 = vadd.f32 %v1650_v10, %v1476_v30  ;;  %v1493_v3 = vmax.f32 %v1485_v28, 0.0 }
 0xa44   :  { %v1821_v9 = vpop.f32.mrf.mxu0 }
 0xa45   :  { %v1488_v58 = vadd.f32 %v1821_v9, %v1650_v10  ;;  %v1491_v59 = vmax.f32 %v1477_v32, 0.0  ;;  %v1497_v16 = vadd.f32 %v1493_v3, %v1409_v52 }
 0xa46   :  { %v1479_v40 = vpop.f32.mrf.mxu0 }
 0xa47   :  { %v1494_v61 = vmax.f32 %v1488_v58, 0.0  ;;  %v1480_v0 = vadd.f32 %v1650_v10, %v1479_v40  ;;  %v1495_v43 = vadd.f32 %v1491_v59, %v1407_v53 }
 0xa49   :  { %v1492_v4 = vmax.f32 %v1480_v0, 0.0  ;;  %v1498_v5 = vadd.f32 %v1494_v61, %v1410_v62 }
 0xa4b   :  { %v1496_v31 = vadd.f32 %v1492_v4, %v1408_v39  ;;  %v1500_v6 = vpack.c.bf16 %v1498_v5, %v1497_v16 }
 0xa4d   :  { %v1499_v63 = vpack.c.bf16 %v1496_v31, %v1495_v43 }
 0xa4f   :  { %1826 = vmatprep.mubr.msk.bf16.mxu1 %vm159_vm1, %v1499_v63 }
 0xa50   :  { %1827 = vmatmul.mubr.msk.bf16.vlgmr.msra.gmra.mxu1 %vm159_vm1, %v1500_v6 }
 0xb10   :  { %v1828_v26 = vpop.f32.mrf.mxu1 }
 0xb11   :  { %v1573_v51 = vadd.f32 %v1828_v26, %v1655_v44 }
 0xb12   :  { %v1564_v60 = vpop.f32.mrf.mxu1 }
 0xb13   :  { %1581 = vst [vmem:[#allocation14 + $0x10] sm:$0xff] %v1573_v51  ;;  %v1565_v33 = vadd.f32 %v1655_v44, %v1564_v60 }
 0xb14   :  { %v1829_v22 = vpop.f32.mrf.mxu1 }
 0xb15   :  { %1579 = vst [vmem:[#allocation14] sm:$0xff] %v1565_v33  ;;  %v1576_v34 = vadd.f32 %v1829_v22, %v1655_v44 }
 0xb16   :  { %v1567_v23 = vpop.f32.mrf.mxu1 }
 0xb17   :  { %1582 = vst [vmem:[#allocation14 + $0x18] sm:$0xff] %v1576_v34  ;;  %v1568_v17 = vadd.f32 %v1655_v44, %v1567_v23 }
 0xb19   :  { %1580 = vst [vmem:[#allocation14 + $0x8] sm:$0xff] %v1568_v17 }
 0xb1a   :  { %2081 = shalt.err (!%p2078_p11)
}
 0xb1b   :  { %1594 = dma.vmem_to_hbm [thread:$0]  %s1589_s10, 512, %s2621_s13, [#allocation4], %s2102_s30, %s2102_s30, %s2103_s14  }
 0xb1c   :  { %2098 = dma.done.wait [#allocation4], 512  }
 0xb1d   :  { %2099 = vsyncadd [#allocation4], 4294966784 }
 0xb1e   :  { %1598 = vsyncpa [#allocation3], 1 }
 0xb1f   :  { %1599 = vsyncpa [#allocation6], 1 }
 0xb20   :  { %1600 = vsyncpa [#allocation9], 1 }
 0xb21   :  { %1601 = vsyncpa [#allocation12], 1 }
 0xb22   :  { %1602 = vsyncpa [#allocation4], 1 }

</bundles_post_ra>
